<compile_context>
chip_gen: v7x
topology: tpu7x:2x2x1
jax: 0.10.0
libtpu: 0.0.40
codegen_flags: <defaults>
</compile_context>

<pallas_src>
import jax
import jax.numpy as jnp
from jax import lax
from jax.experimental import pallas as pl
from jax.experimental.pallas import tpu as pltpu

_LN2 = 0.6931471805599453


def shifted_softplus(x):
    # ssp(x) = softplus(x) - ln(2), numerically stable form without log1p
    return jnp.maximum(x, 0.0) + jnp.log(jnp.exp(-jnp.abs(x)) + 1.0) - _LN2


def _output_physnet_kernel(feat_ref, w1_ref, w2_ref, b12_ref, wout_ref, out_ref):
    """One atom tile: apply all n_blocks OutputBlocks and sum their predictions."""
    n_blocks = feat_ref.shape[0]

    def body(ib, acc):
        x = feat_ref[ib]                                   # (T, F)
        b12 = b12_ref[ib]                                  # (2, F) -> [b1; b2]

        # PhysNet residual layer (n_residual = 1), pre-activation style
        y = shifted_softplus(x)
        y = shifted_softplus(
            jnp.dot(y, w1_ref[ib], preferred_element_type=jnp.float32)
            + b12[0:1, :])
        y = jnp.dot(y, w2_ref[ib], preferred_element_type=jnp.float32) + b12[1:2, :]
        x = x + y

        # Final bias-free dense to n_property (= 2: [atomic_energies, atomic_charges])
        return acc + jnp.dot(x, wout_ref[ib], preferred_element_type=jnp.float32)

    acc = lax.fori_loop(0, n_blocks, body,
                        jnp.zeros(out_ref.shape, jnp.float32), unroll=True)
    out_ref[...] = acc


def _round_up(x, m):
    return ((x + m - 1) // m) * m


def output_physnet_forward(features, w1, b1, w2, b2, wout,
                           scaling_energies, scaling_charges, atomic_numbers,
                           *, max_atom_tile=512):
    """features: (n_blocks, N_atoms, n_atombasis); weights stacked per block."""
    n_blocks, n_atoms, n_feat = features.shape
    n_prop = wout.shape[-1]

    # Merge both residual-layer biases into a single input (one DMA stream).
    b12 = jnp.concatenate([b1, b2], axis=1).astype(jnp.float32)     # (n_blocks, 2, F)

    # Tile the atom (sublane) axis; pad so the grid divides evenly.
    n_pad = _round_up(max(n_atoms, 8), 8)
    if n_pad <= max_atom_tile:
        tile = n_pad
    else:
        tile = max_atom_tile
        n_pad = _round_up(n_atoms, tile)
    num_tiles = n_pad // tile
    if n_pad != n_atoms:
        features = jnp.pad(features, ((0, 0), (0, n_pad - n_atoms), (0, 0)))

    out = pl.pallas_call(
        _output_physnet_kernel,
        out_shape=jax.ShapeDtypeStruct((n_pad, n_prop), jnp.float32),
        grid_spec=pltpu.PrefetchScalarGridSpec(
            num_scalar_prefetch=0,
            grid=(num_tiles,),
            in_specs=[
                # features: tiled along the atom axis, all blocks per tile
                pl.BlockSpec((n_blocks, tile, n_feat), lambda t: (0, t, 0)),
                # weights: constant index map -> DMA'd once, resident across tiles
                pl.BlockSpec((n_blocks, n_feat, n_feat), lambda t: (0, 0, 0)),   # W1
                pl.BlockSpec((n_blocks, n_feat, n_feat), lambda t: (0, 0, 0)),   # W2
                pl.BlockSpec((n_blocks, 2, n_feat), lambda t: (0, 0, 0)),        # [b1;b2]
                pl.BlockSpec((n_blocks, n_feat, n_prop), lambda t: (0, 0, 0)),   # Wout
            ],
            out_specs=pl.BlockSpec((tile, n_prop), lambda t: (t, 0)),
        ),
        compiler_params=pltpu.CompilerParams(
            dimension_semantics=("parallel",)),
    )(features.astype(jnp.float32), w1.astype(jnp.float32),
      w2.astype(jnp.float32), b12, wout.astype(jnp.float32))

    out = out[:n_atoms]

    # Per-atom-type property scaling (gather + FMA) stays in plain JAX -> fuses in XLA.
    # Column convention matches torch module: col 0 = shift, col 1 = scale.
    e = out[:, 0]
    q = out[:, 1]
    e = e * scaling_energies[atomic_numbers, 1] + scaling_energies[atomic_numbers, 0]
    q = q * scaling_charges[atomic_numbers, 1] + scaling_charges[atomic_numbers, 0]

    # output_n_property == 2 -> no flatten; split fused head (matches torch module)
    return {"atomic_energies": e, "atomic_charges": q}


def output_physnet_reference(features, w1, b1, w2, b2, wout,
                             scaling_energies, scaling_charges, atomic_numbers):
    """Pure-JAX reference mirroring Output_PhysNet.forward (eval mode)."""
    n_blocks = features.shape[0]
    pred = None
    for ib in range(n_blocks):
        x = features[ib]
        y = shifted_softplus(x)
        y = shifted_softplus(y @ w1[ib] + b1[ib])
        y = y @ w2[ib] + b2[ib]
        x = x + y
        p = x @ wout[ib]
        pred = p if pred is None else pred + p
    e = pred[:, 0]
    q = pred[:, 1]
    e = e * scaling_energies[atomic_numbers, 1] + scaling_energies[atomic_numbers, 0]
    q = q * scaling_charges[atomic_numbers, 1] + scaling_charges[atomic_numbers, 0]
    return {"atomic_energies": e, "atomic_charges": q}


if __name__ == "__main__":
    # Small shapes consistent with the module
    n_blocks = 3         # graph_n_blocks
    n_atoms = 32         # N_atoms
    n_atombasis = 128    # input_n_atombasis
    n_maxatom = 20       # input_n_maxatom -> scaling tables of size n_maxatom + 1
    n_prop = 2           # fused atomic_energies_charges head

    key = jax.random.PRNGKey(0)
    keys = jax.random.split(key, 10)

    features = jax.random.normal(keys[0], (n_blocks, n_atoms, n_atombasis),
                                 dtype=jnp.float32)
    w1 = 0.1 * jax.random.normal(keys[1], (n_blocks, n_atombasis, n_atombasis),
                                 dtype=jnp.float32)
    b1 = 0.1 * jax.random.normal(keys[2], (n_blocks, 1, n_atombasis),
                                 dtype=jnp.float32)
    w2 = 0.1 * jax.random.normal(keys[3], (n_blocks, n_atombasis, n_atombasis),
                                 dtype=jnp.float32)
    b2 = 0.1 * jax.random.normal(keys[4], (n_blocks, 1, n_atombasis),
                                 dtype=jnp.float32)
    # NOTE: PhysNet zero-inits the output dense; use small random weights so the
    # synthetic kernel exercises the full path. Weights kept in f32 (bf16 weight
    # cast is a further v5e/v6e bandwidth option but would loosen the 1e-4 check).
    wout = 0.1 * jax.random.normal(keys[5], (n_blocks, n_atombasis, n_prop),
                                   dtype=jnp.float32)

    # Per-atom-type [shift, scale] tables for atomic_energies / atomic_charges
    scaling_energies = jnp.stack(
        [0.5 * jax.random.normal(keys[6], (n_maxatom + 1,), dtype=jnp.float32),
         1.0 + 0.1 * jax.random.normal(keys[7], (n_maxatom + 1,),
                                       dtype=jnp.float32)], axis=-1)
    scaling_charges = jnp.stack(
        [0.1 * jax.random.normal(keys[8], (n_maxatom + 1,), dtype=jnp.float32),
         1.0 + 0.05 * jax.random.normal(keys[9], (n_maxatom + 1,),
                                        dtype=jnp.float32)], axis=-1)

    atomic_numbers = jax.random.randint(jax.random.PRNGKey(1), (n_atoms,),
                                        minval=1, maxval=n_maxatom + 1)

    out = output_physnet_forward(features, w1, b1, w2, b2, wout,
                                 scaling_energies, scaling_charges,
                                 atomic_numbers)
    out = jax.tree_util.tree_map(jax.block_until_ready, out)

    ref = output_physnet_reference(features, w1, b1, w2, b2, wout,
                                   scaling_energies, scaling_charges,
                                   atomic_numbers)

    for name in ("atomic_energies", "atomic_charges"):
        assert out[name].shape == (n_atoms,), (name, out[name].shape)
        err = float(jnp.max(jnp.abs(out[name] - ref[name])))
        assert err < 1e-4, (name, err)

    # TODO(synk): training-mode nhloss branch and 'forces' (gradient of energy w.r.t.
    # positions, computed outside this module) are not part of this kernel.
    print("KERNEL_OK")
</pallas_src>

<mosaic_0001>
module attributes {stable_mosaic.version = 11 : i64} {
  func.func @_output_physnet_kernel(%arg0: i32, %arg1: memref<3x32x128xf32, #tpu.memory_space<vmem>>, %arg2: memref<3x128x128xf32, #tpu.memory_space<vmem>>, %arg3: memref<3x128x128xf32, #tpu.memory_space<vmem>>, %arg4: memref<3x2x128xf32, #tpu.memory_space<vmem>>, %arg5: memref<3x128x2xf32, #tpu.memory_space<vmem>>, %arg6: memref<32x2xf32, #tpu.memory_space<vmem>>) attributes {dimension_semantics = [#tpu.dimension_semantics<parallel>], iteration_bounds = array<i64: 1>, scalar_prefetch = 0 : i64, scratch_operands = 0 : i64, tpu.core_type = #tpu.core_type<tc>, window_params = [{transform_indices = @transform_0, window_bounds = array<i64: 3, 32, 128>}, {pipeline_mode = #tpu.pipeline_mode<synchronous>, transform_indices = @transform_1, window_bounds = array<i64: 3, 128, 128>}, {pipeline_mode = #tpu.pipeline_mode<synchronous>, transform_indices = @transform_2, window_bounds = array<i64: 3, 128, 128>}, {pipeline_mode = #tpu.pipeline_mode<synchronous>, transform_indices = @transform_3, window_bounds = array<i64: 3, 2, 128>}, {pipeline_mode = #tpu.pipeline_mode<synchronous>, transform_indices = @transform_4, window_bounds = array<i64: 3, 128, 2>}, {transform_indices = @transform_5, window_bounds = array<i64: 32, 2>}]} {
    %cst = arith.constant 0.000000e+00 : f32
    %0 = vector.broadcast %cst : f32 to vector<32x2xf32>
    %c0_i32 = arith.constant 0 : i32
    %1 = arith.index_cast %c0_i32 : i32 to index
    %c0 = arith.constant 0 : index
    %c0_0 = arith.constant 0 : index
    %2 = vector.load %arg1[%1, %c0, %c0_0] : memref<3x32x128xf32, #tpu.memory_space<vmem>>, vector<1x32x128xf32>
    %3 = vector.shape_cast %2 : vector<1x32x128xf32> to vector<32x128xf32>
    %4 = arith.index_cast %c0_i32 : i32 to index
    %c0_1 = arith.constant 0 : index
    %c0_2 = arith.constant 0 : index
    %5 = vector.load %arg4[%4, %c0_1, %c0_2] : memref<3x2x128xf32, #tpu.memory_space<vmem>>, vector<1x2x128xf32>
    %6 = vector.shape_cast %5 : vector<1x2x128xf32> to vector<2x128xf32>
    %cst_3 = arith.constant 0.000000e+00 : f32
    %7 = vector.broadcast %cst_3 : f32 to vector<32x128xf32>
    %8 = arith.maximumf %3, %7 : vector<32x128xf32>
    %9 = math.absf %3 : vector<32x128xf32>
    %cst_4 = arith.constant 0.000000e+00 : f32
    %10 = vector.broadcast %cst_4 : f32 to vector<32x128xf32>
    %11 = arith.subf %10, %9 : vector<32x128xf32>
    %12 = math.exp %11 : vector<32x128xf32>
    %cst_5 = arith.constant 1.000000e+00 : f32
    %13 = vector.broadcast %cst_5 : f32 to vector<32x128xf32>
    %14 = arith.addf %12, %13 : vector<32x128xf32>
    %15 = math.log %14 : vector<32x128xf32>
    %16 = arith.addf %8, %15 : vector<32x128xf32>
    %cst_6 = arith.constant 0.693147182 : f32
    %17 = vector.broadcast %cst_6 : f32 to vector<32x128xf32>
    %18 = arith.subf %16, %17 : vector<32x128xf32>
    %19 = arith.index_cast %c0_i32 : i32 to index
    %c0_7 = arith.constant 0 : index
    %c0_8 = arith.constant 0 : index
    %20 = vector.load %arg2[%19, %c0_7, %c0_8] : memref<3x128x128xf32, #tpu.memory_space<vmem>>, vector<1x128x128xf32>
    %21 = vector.shape_cast %20 : vector<1x128x128xf32> to vector<128x128xf32>
    %cst_9 = arith.constant dense<0.000000e+00> : vector<32x128xf32>
    %22 = tpu.matmul %18, %21, %cst_9 {dimension_numbers = #tpu.dot_dimension_numbers<[1], [0], [0], [1], [0, 0, 1, 1], [], []>} : vector<32x128xf32>, vector<128x128xf32>, vector<32x128xf32> -> vector<32x128xf32>
    %23 = vector.extract_strided_slice %6 {offsets = [0, 0], sizes = [1, 128], strides = [1, 1]} : vector<2x128xf32> to vector<1x128xf32>
    %24 = vector.broadcast %23 : vector<1x128xf32> to vector<32x128xf32>
    %25 = arith.addf %22, %24 : vector<32x128xf32>
    %cst_10 = arith.constant 0.000000e+00 : f32
    %26 = vector.broadcast %cst_10 : f32 to vector<32x128xf32>
    %27 = arith.maximumf %25, %26 : vector<32x128xf32>
    %28 = math.absf %25 : vector<32x128xf32>
    %cst_11 = arith.constant 0.000000e+00 : f32
    %29 = vector.broadcast %cst_11 : f32 to vector<32x128xf32>
    %30 = arith.subf %29, %28 : vector<32x128xf32>
    %31 = math.exp %30 : vector<32x128xf32>
    %cst_12 = arith.constant 1.000000e+00 : f32
    %32 = vector.broadcast %cst_12 : f32 to vector<32x128xf32>
    %33 = arith.addf %31, %32 : vector<32x128xf32>
    %34 = math.log %33 : vector<32x128xf32>
    %35 = arith.addf %27, %34 : vector<32x128xf32>
    %cst_13 = arith.constant 0.693147182 : f32
    %36 = vector.broadcast %cst_13 : f32 to vector<32x128xf32>
    %37 = arith.subf %35, %36 : vector<32x128xf32>
    %38 = arith.index_cast %c0_i32 : i32 to index
    %c0_14 = arith.constant 0 : index
    %c0_15 = arith.constant 0 : index
    %39 = vector.load %arg3[%38, %c0_14, %c0_15] : memref<3x128x128xf32, #tpu.memory_space<vmem>>, vector<1x128x128xf32>
    %40 = vector.shape_cast %39 : vector<1x128x128xf32> to vector<128x128xf32>
    %cst_16 = arith.constant dense<0.000000e+00> : vector<32x128xf32>
    %41 = tpu.matmul %37, %40, %cst_16 {dimension_numbers = #tpu.dot_dimension_numbers<[1], [0], [0], [1], [0, 0, 1, 1], [], []>} : vector<32x128xf32>, vector<128x128xf32>, vector<32x128xf32> -> vector<32x128xf32>
    %42 = vector.extract_strided_slice %6 {offsets = [1, 0], sizes = [1, 128], strides = [1, 1]} : vector<2x128xf32> to vector<1x128xf32>
    %43 = vector.broadcast %42 : vector<1x128xf32> to vector<32x128xf32>
    %44 = arith.addf %41, %43 : vector<32x128xf32>
    %45 = arith.addf %3, %44 : vector<32x128xf32>
    %46 = arith.index_cast %c0_i32 : i32 to index
    %c0_17 = arith.constant 0 : index
    %c0_18 = arith.constant 0 : index
    %47 = vector.load %arg5[%46, %c0_17, %c0_18] : memref<3x128x2xf32, #tpu.memory_space<vmem>>, vector<1x128x2xf32>
    %48 = vector.shape_cast %47 : vector<1x128x2xf32> to vector<128x2xf32>
    %cst_19 = arith.constant dense<0.000000e+00> : vector<32x2xf32>
    %49 = tpu.matmul %45, %48, %cst_19 {dimension_numbers = #tpu.dot_dimension_numbers<[1], [0], [0], [1], [0, 0, 1, 1], [], []>} : vector<32x128xf32>, vector<128x2xf32>, vector<32x2xf32> -> vector<32x2xf32>
    %50 = arith.addf %0, %49 : vector<32x2xf32>
    %c1_i32 = arith.constant 1 : i32
    %51 = arith.index_cast %c1_i32 : i32 to index
    %c0_20 = arith.constant 0 : index
    %c0_21 = arith.constant 0 : index
    %52 = vector.load %arg1[%51, %c0_20, %c0_21] : memref<3x32x128xf32, #tpu.memory_space<vmem>>, vector<1x32x128xf32>
    %53 = vector.shape_cast %52 : vector<1x32x128xf32> to vector<32x128xf32>
    %54 = arith.index_cast %c1_i32 : i32 to index
    %c0_22 = arith.constant 0 : index
    %c0_23 = arith.constant 0 : index
    %55 = vector.load %arg4[%54, %c0_22, %c0_23] : memref<3x2x128xf32, #tpu.memory_space<vmem>>, vector<1x2x128xf32>
    %56 = vector.shape_cast %55 : vector<1x2x128xf32> to vector<2x128xf32>
    %cst_24 = arith.constant 0.000000e+00 : f32
    %57 = vector.broadcast %cst_24 : f32 to vector<32x128xf32>
    %58 = arith.maximumf %53, %57 : vector<32x128xf32>
    %59 = math.absf %53 : vector<32x128xf32>
    %cst_25 = arith.constant 0.000000e+00 : f32
    %60 = vector.broadcast %cst_25 : f32 to vector<32x128xf32>
    %61 = arith.subf %60, %59 : vector<32x128xf32>
    %62 = math.exp %61 : vector<32x128xf32>
    %cst_26 = arith.constant 1.000000e+00 : f32
    %63 = vector.broadcast %cst_26 : f32 to vector<32x128xf32>
    %64 = arith.addf %62, %63 : vector<32x128xf32>
    %65 = math.log %64 : vector<32x128xf32>
    %66 = arith.addf %58, %65 : vector<32x128xf32>
    %cst_27 = arith.constant 0.693147182 : f32
    %67 = vector.broadcast %cst_27 : f32 to vector<32x128xf32>
    %68 = arith.subf %66, %67 : vector<32x128xf32>
    %69 = arith.index_cast %c1_i32 : i32 to index
    %c0_28 = arith.constant 0 : index
    %c0_29 = arith.constant 0 : index
    %70 = vector.load %arg2[%69, %c0_28, %c0_29] : memref<3x128x128xf32, #tpu.memory_space<vmem>>, vector<1x128x128xf32>
    %71 = vector.shape_cast %70 : vector<1x128x128xf32> to vector<128x128xf32>
    %cst_30 = arith.constant dense<0.000000e+00> : vector<32x128xf32>
    %72 = tpu.matmul %68, %71, %cst_30 {dimension_numbers = #tpu.dot_dimension_numbers<[1], [0], [0], [1], [0, 0, 1, 1], [], []>} : vector<32x128xf32>, vector<128x128xf32>, vector<32x128xf32> -> vector<32x128xf32>
    %73 = vector.extract_strided_slice %56 {offsets = [0, 0], sizes = [1, 128], strides = [1, 1]} : vector<2x128xf32> to vector<1x128xf32>
    %74 = vector.broadcast %73 : vector<1x128xf32> to vector<32x128xf32>
    %75 = arith.addf %72, %74 : vector<32x128xf32>
    %cst_31 = arith.constant 0.000000e+00 : f32
    %76 = vector.broadcast %cst_31 : f32 to vector<32x128xf32>
    %77 = arith.maximumf %75, %76 : vector<32x128xf32>
    %78 = math.absf %75 : vector<32x128xf32>
    %cst_32 = arith.constant 0.000000e+00 : f32
    %79 = vector.broadcast %cst_32 : f32 to vector<32x128xf32>
    %80 = arith.subf %79, %78 : vector<32x128xf32>
    %81 = math.exp %80 : vector<32x128xf32>
    %cst_33 = arith.constant 1.000000e+00 : f32
    %82 = vector.broadcast %cst_33 : f32 to vector<32x128xf32>
    %83 = arith.addf %81, %82 : vector<32x128xf32>
    %84 = math.log %83 : vector<32x128xf32>
    %85 = arith.addf %77, %84 : vector<32x128xf32>
    %cst_34 = arith.constant 0.693147182 : f32
    %86 = vector.broadcast %cst_34 : f32 to vector<32x128xf32>
    %87 = arith.subf %85, %86 : vector<32x128xf32>
    %88 = arith.index_cast %c1_i32 : i32 to index
    %c0_35 = arith.constant 0 : index
    %c0_36 = arith.constant 0 : index
    %89 = vector.load %arg3[%88, %c0_35, %c0_36] : memref<3x128x128xf32, #tpu.memory_space<vmem>>, vector<1x128x128xf32>
    %90 = vector.shape_cast %89 : vector<1x128x128xf32> to vector<128x128xf32>
    %cst_37 = arith.constant dense<0.000000e+00> : vector<32x128xf32>
    %91 = tpu.matmul %87, %90, %cst_37 {dimension_numbers = #tpu.dot_dimension_numbers<[1], [0], [0], [1], [0, 0, 1, 1], [], []>} : vector<32x128xf32>, vector<128x128xf32>, vector<32x128xf32> -> vector<32x128xf32>
    %92 = vector.extract_strided_slice %56 {offsets = [1, 0], sizes = [1, 128], strides = [1, 1]} : vector<2x128xf32> to vector<1x128xf32>
    %93 = vector.broadcast %92 : vector<1x128xf32> to vector<32x128xf32>
    %94 = arith.addf %91, %93 : vector<32x128xf32>
    %95 = arith.addf %53, %94 : vector<32x128xf32>
    %96 = arith.index_cast %c1_i32 : i32 to index
    %c0_38 = arith.constant 0 : index
    %c0_39 = arith.constant 0 : index
    %97 = vector.load %arg5[%96, %c0_38, %c0_39] : memref<3x128x2xf32, #tpu.memory_space<vmem>>, vector<1x128x2xf32>
    %98 = vector.shape_cast %97 : vector<1x128x2xf32> to vector<128x2xf32>
    %cst_40 = arith.constant dense<0.000000e+00> : vector<32x2xf32>
    %99 = tpu.matmul %95, %98, %cst_40 {dimension_numbers = #tpu.dot_dimension_numbers<[1], [0], [0], [1], [0, 0, 1, 1], [], []>} : vector<32x128xf32>, vector<128x2xf32>, vector<32x2xf32> -> vector<32x2xf32>
    %100 = arith.addf %50, %99 : vector<32x2xf32>
    %c2_i32 = arith.constant 2 : i32
    %101 = arith.index_cast %c2_i32 : i32 to index
    %c0_41 = arith.constant 0 : index
    %c0_42 = arith.constant 0 : index
    %102 = vector.load %arg1[%101, %c0_41, %c0_42] : memref<3x32x128xf32, #tpu.memory_space<vmem>>, vector<1x32x128xf32>
    %103 = vector.shape_cast %102 : vector<1x32x128xf32> to vector<32x128xf32>
    %104 = arith.index_cast %c2_i32 : i32 to index
    %c0_43 = arith.constant 0 : index
    %c0_44 = arith.constant 0 : index
    %105 = vector.load %arg4[%104, %c0_43, %c0_44] : memref<3x2x128xf32, #tpu.memory_space<vmem>>, vector<1x2x128xf32>
    %106 = vector.shape_cast %105 : vector<1x2x128xf32> to vector<2x128xf32>
    %cst_45 = arith.constant 0.000000e+00 : f32
    %107 = vector.broadcast %cst_45 : f32 to vector<32x128xf32>
    %108 = arith.maximumf %103, %107 : vector<32x128xf32>
    %109 = math.absf %103 : vector<32x128xf32>
    %cst_46 = arith.constant 0.000000e+00 : f32
    %110 = vector.broadcast %cst_46 : f32 to vector<32x128xf32>
    %111 = arith.subf %110, %109 : vector<32x128xf32>
    %112 = math.exp %111 : vector<32x128xf32>
    %cst_47 = arith.constant 1.000000e+00 : f32
    %113 = vector.broadcast %cst_47 : f32 to vector<32x128xf32>
    %114 = arith.addf %112, %113 : vector<32x128xf32>
    %115 = math.log %114 : vector<32x128xf32>
    %116 = arith.addf %108, %115 : vector<32x128xf32>
    %cst_48 = arith.constant 0.693147182 : f32
    %117 = vector.broadcast %cst_48 : f32 to vector<32x128xf32>
    %118 = arith.subf %116, %117 : vector<32x128xf32>
    %119 = arith.index_cast %c2_i32 : i32 to index
    %c0_49 = arith.constant 0 : index
    %c0_50 = arith.constant 0 : index
    %120 = vector.load %arg2[%119, %c0_49, %c0_50] : memref<3x128x128xf32, #tpu.memory_space<vmem>>, vector<1x128x128xf32>
    %121 = vector.shape_cast %120 : vector<1x128x128xf32> to vector<128x128xf32>
    %cst_51 = arith.constant dense<0.000000e+00> : vector<32x128xf32>
    %122 = tpu.matmul %118, %121, %cst_51 {dimension_numbers = #tpu.dot_dimension_numbers<[1], [0], [0], [1], [0, 0, 1, 1], [], []>} : vector<32x128xf32>, vector<128x128xf32>, vector<32x128xf32> -> vector<32x128xf32>
    %123 = vector.extract_strided_slice %106 {offsets = [0, 0], sizes = [1, 128], strides = [1, 1]} : vector<2x128xf32> to vector<1x128xf32>
    %124 = vector.broadcast %123 : vector<1x128xf32> to vector<32x128xf32>
    %125 = arith.addf %122, %124 : vector<32x128xf32>
    %cst_52 = arith.constant 0.000000e+00 : f32
    %126 = vector.broadcast %cst_52 : f32 to vector<32x128xf32>
    %127 = arith.maximumf %125, %126 : vector<32x128xf32>
    %128 = math.absf %125 : vector<32x128xf32>
    %cst_53 = arith.constant 0.000000e+00 : f32
    %129 = vector.broadcast %cst_53 : f32 to vector<32x128xf32>
    %130 = arith.subf %129, %128 : vector<32x128xf32>
    %131 = math.exp %130 : vector<32x128xf32>
    %cst_54 = arith.constant 1.000000e+00 : f32
    %132 = vector.broadcast %cst_54 : f32 to vector<32x128xf32>
    %133 = arith.addf %131, %132 : vector<32x128xf32>
    %134 = math.log %133 : vector<32x128xf32>
    %135 = arith.addf %127, %134 : vector<32x128xf32>
    %cst_55 = arith.constant 0.693147182 : f32
    %136 = vector.broadcast %cst_55 : f32 to vector<32x128xf32>
    %137 = arith.subf %135, %136 : vector<32x128xf32>
    %138 = arith.index_cast %c2_i32 : i32 to index
    %c0_56 = arith.constant 0 : index
    %c0_57 = arith.constant 0 : index
    %139 = vector.load %arg3[%138, %c0_56, %c0_57] : memref<3x128x128xf32, #tpu.memory_space<vmem>>, vector<1x128x128xf32>
    %140 = vector.shape_cast %139 : vector<1x128x128xf32> to vector<128x128xf32>
    %cst_58 = arith.constant dense<0.000000e+00> : vector<32x128xf32>
    %141 = tpu.matmul %137, %140, %cst_58 {dimension_numbers = #tpu.dot_dimension_numbers<[1], [0], [0], [1], [0, 0, 1, 1], [], []>} : vector<32x128xf32>, vector<128x128xf32>, vector<32x128xf32> -> vector<32x128xf32>
    %142 = vector.extract_strided_slice %106 {offsets = [1, 0], sizes = [1, 128], strides = [1, 1]} : vector<2x128xf32> to vector<1x128xf32>
    %143 = vector.broadcast %142 : vector<1x128xf32> to vector<32x128xf32>
    %144 = arith.addf %141, %143 : vector<32x128xf32>
    %145 = arith.addf %103, %144 : vector<32x128xf32>
    %146 = arith.index_cast %c2_i32 : i32 to index
    %c0_59 = arith.constant 0 : index
    %c0_60 = arith.constant 0 : index
    %147 = vector.load %arg5[%146, %c0_59, %c0_60] : memref<3x128x2xf32, #tpu.memory_space<vmem>>, vector<1x128x2xf32>
    %148 = vector.shape_cast %147 : vector<1x128x2xf32> to vector<128x2xf32>
    %cst_61 = arith.constant dense<0.000000e+00> : vector<32x2xf32>
    %149 = tpu.matmul %145, %148, %cst_61 {dimension_numbers = #tpu.dot_dimension_numbers<[1], [0], [0], [1], [0, 0, 1, 1], [], []>} : vector<32x128xf32>, vector<128x2xf32>, vector<32x2xf32> -> vector<32x2xf32>
    %150 = arith.addf %100, %149 : vector<32x2xf32>
    %c3_i32 = arith.constant 3 : i32
    %c0_62 = arith.constant 0 : index
    %c0_63 = arith.constant 0 : index
    %151 = vector.load %arg6[%c0_62, %c0_63] : memref<32x2xf32, #tpu.memory_space<vmem>>, vector<32x2xf32>
    tpu.vector_store %arg6[%c0_62, %c0_63], %150 {strides = array<i32>} : memref<32x2xf32, #tpu.memory_space<vmem>>, vector<32x2xf32>,
    return
  }
  func.func @transform_0(%arg0: i32) -> (i32, i32, i32) {
    %c0_i32 = arith.constant 0 : i32
    %c0_i32_0 = arith.constant 0 : i32
    %c0_i32_1 = arith.constant 0 : i32
    return %c0_i32, %arg0, %c0_i32_0 : i32, i32, i32
  }
  func.func @transform_1(%arg0: i32) -> (i32, i32, i32) {
    %c0_i32 = arith.constant 0 : i32
    %c0_i32_0 = arith.constant 0 : i32
    %c0_i32_1 = arith.constant 0 : i32
    %c0_i32_2 = arith.constant 0 : i32
    return %c0_i32, %c0_i32_0, %c0_i32_1 : i32, i32, i32
  }
  func.func @transform_2(%arg0: i32) -> (i32, i32, i32) {
    %c0_i32 = arith.constant 0 : i32
    %c0_i32_0 = arith.constant 0 : i32
    %c0_i32_1 = arith.constant 0 : i32
    %c0_i32_2 = arith.constant 0 : i32
    return %c0_i32, %c0_i32_0, %c0_i32_1 : i32, i32, i32
  }
  func.func @transform_3(%arg0: i32) -> (i32, i32, i32) {
    %c0_i32 = arith.constant 0 : i32
    %c0_i32_0 = arith.constant 0 : i32
    %c0_i32_1 = arith.constant 0 : i32
    %c0_i32_2 = arith.constant 0 : i32
    return %c0_i32, %c0_i32_0, %c0_i32_1 : i32, i32, i32
  }
  func.func @transform_4(%arg0: i32) -> (i32, i32, i32) {
    %c0_i32 = arith.constant 0 : i32
    %c0_i32_0 = arith.constant 0 : i32
    %c0_i32_1 = arith.constant 0 : i32
    %c0_i32_2 = arith.constant 0 : i32
    return %c0_i32, %c0_i32_0, %c0_i32_1 : i32, i32, i32
  }
  func.func @transform_5(%arg0: i32) -> (i32, i32) {
    %c0_i32 = arith.constant 0 : i32
    %c0_i32_0 = arith.constant 0 : i32
    return %arg0, %c0_i32 : i32, i32
  }
}

</mosaic_0001>

<bundles_post_ra>
// kernel: tpu_custom_call.1
= control target key start
LH: loop header
LB: loop body
LE: loop exit
PB: predicated region body
PF: predicated region fallthrough
CT: control target
= control target key end

     0   :  { %10 = vsyncpa [#allocation3], 0  ;;  %s2845_s0 = inlined_call_operand.hbm [shape: f32[3,32,128], index: 0, kind: input, shape index: {}]   ;;  %s2846_s1 = inlined_call_operand.vmem [shape: f32[3,128,128], index: 1, kind: input, shape index: {}]   ;;  %s2847_s2 = inlined_call_operand.hbm [shape: f32[3,128,128], index: 2, kind: input, shape index: {}]   ;;  %s2848_s3 = inlined_call_operand.vmem [shape: f32[3,2,128], index: 3, kind: input, shape index: {}]   ;;  %s2849_s4 = inlined_call_operand.vmem [shape: f32[3,128,2], index: 4, kind: input, shape index: {}]   ;;  %s2850_s5 = inlined_call_operand.vmem [shape: f32[32,2], index: 5, kind: output, shape index: {}]  }
   0x1   :  { %11 = vsyncpa [#allocation5], 0  ;;  %s2353_s18 = smov [#allocation2]   ;;  %s2305_s22 = scalar_lea.hbm %s2845_s0, 1536 }
   0x2   :  { %s17_s19 = sshll.u32 %s2353_s18, 4  ;;  %p2306_p0 = scmp.ne.s32.totalorder %s2845_s0, %s2305_s22  ;;  %s18_s19 = int_to_ptr.vmem [resolvable:$true] %s17_s19 }
   0x3   :  { %p2309_p1 = scmp.lt.u32.totalorder %s2305_s22, %s2845_s0 }
   0x5   :  { %p2311_p2 = pnand %p2309_p1, %p2306_p0 }
   0x7   :  { %2314 = shalt.err (!%p2311_p2)
}
   0x8   :  { %s2315_s27 = scalar_lea.vmem %s18_s19, 1536  ;;  %p2320_p4 = scmp.lt.s32.totalorder %s18_s19, %s18_s19 }
   0x9   :  { %p2316_p3 = scmp.ne.s32.totalorder %s18_s19, %s2315_s27  ;;  %p2321_p5 = scmp.lt.s32.totalorder %s2315_s27, %s2315_s27 }
   0xb   :  { %p2322_p6 = por %p2321_p5, %p2320_p4 }
   0xd   :  { %p2323_p7 = pnand %p2322_p6, %p2316_p3 }
   0xf   :  { %2326 = shalt.err (!%p2323_p7)
}
  0x10   :  { %s2354_s28 = smov 128   ;;  %s2355_s29 = smov 8  }
  0x11   :  { %23 = dma.hbm_to_vmem [thread:$0]  %s2845_s0, 1536, %s18_s19, [#allocation3], %s2354_s28, %s2354_s28, %s2355_s29  }
  0x12   :  { %s2356_s7 = smov [#allocation4]   ;;  %s2327_s11 = scalar_lea.hbm %s2847_s2, 6144 }
  0x13   :  { %s31_s8 = sshll.u32 %s2356_s7, 4  ;;  %p2328_p8 = scmp.ne.s32.totalorder %s2847_s2, %s2327_s11  ;;  %s32_s8 = int_to_ptr.vmem [resolvable:$true] %s31_s8 }
  0x14   :  { %p2331_p9 = scmp.lt.u32.totalorder %s2327_s11, %s2847_s2 }
  0x16   :  { %p2333_p10 = pnand %p2331_p9, %p2328_p8 }
  0x18   :  { %2336 = shalt.err (!%p2333_p10)
}
  0x19   :  { %s2337_s16 = scalar_lea.vmem %s32_s8, 6144  ;;  %p2342_p12 = scmp.lt.s32.totalorder %s32_s8, %s32_s8 }
  0x1a   :  { %p2338_p11 = scmp.ne.s32.totalorder %s32_s8, %s2337_s16  ;;  %p2343_p13 = scmp.lt.s32.totalorder %s2337_s16, %s2337_s16 }
  0x1c   :  { %p2344_p0 = por %p2343_p13, %p2342_p12 }
  0x1e   :  { %p2345_p1 = pnand %p2344_p0, %p2338_p11 }
  0x20   :  { %2348 = shalt.err (!%p2345_p1)
}
  0x21   :  { %37 = dma.hbm_to_vmem [thread:$0]  %s2847_s2, 6144, %s32_s8, [#allocation5], %s2354_s28, %s2354_s28, %s2355_s29  }
  0x22   :  { %2349 = dma.done.wait [#allocation3], 1536  }
  0x23   :  { %2350 = vsyncadd [#allocation3], 4294965760 }
  0x24   :  { %2351 = dma.done.wait [#allocation5], 6144  }
  0x25   :  { %2352 = vsyncadd [#allocation5], 4294961152  ;;  %v93_v0 = vld [vmem:[%s2846_s1] sm:$0xff]  ;;  %v94_v1 = vld [vmem:[%s2846_s1 + $0x8] sm:$0xff]  ;;  %vm1262_vm0 = vcmask 15360  }
  0x26   :  { %v95_v2 = vld [vmem:[%s2846_s1 + $0x10] sm:$0xff]  ;;  %v1885_v3 = vpack.c.bf16 %v94_v1, %v93_v0  ;;  %v96_v4 = vld [vmem:[%s2846_s1 + $0x18] sm:$0xff]  ;;  %v97_v6 = vld [vmem:[%s2846_s1 + $0x20] sm:$0xff] }
  0x27   :  { %v1889_v5 = vpack.c.bf16 %v96_v4, %v95_v2  ;;  %v98_v7 = vld [vmem:[%s2846_s1 + $0x28] sm:$0xff]  ;;  %v99_v9 = vld [vmem:[%s2846_s1 + $0x30] sm:$0xff]  ;;  %v2432_v10 = vld [vmem:[#allocation2] sm:$0xff] }
  0x28   :  { %1886 = vmatprep.subr.bf16.mxu0 %v1885_v3  ;;  %v1893_v8 = vpack.c.bf16 %v98_v7, %v97_v6  ;;  %v100_v11 = vld [vmem:[%s2846_s1 + $0x38] sm:$0xff]  ;;  %v57_v12 = vand.u32 2147483647, %v2432_v10  ;;  %v2438_v13 = vld [vmem:[#allocation2 + $0x8] sm:$0xff]  ;;  %v2440_v14 = vld [vmem:[#allocation2 + $0x10] sm:$0xff] }
  0x29   :  { %1888 = vmatpush3.bf16.msra.mxu0 %v1885_v3  ;;  %v58_v15 = vand.u32 2147483647, %v2438_v13  ;;  %v59_v17 = vand.u32 2147483647, %v2440_v14  ;;  %v2444_v18 = vld [vmem:[#allocation2 + $0x18] sm:$0xff]  ;;  %v1897_v19 = vpack.c.bf16 %v100_v11, %v99_v9  ;;  %v101_v22 = vld [vmem:[%s2846_s1 + $0x40] sm:$0xff] }
  0x2a   :  { %1890 = vmatprep.subr.bf16.mxu0 %v1889_v5  ;;  %v61_v16 = vsub.f32 0.0, %v57_v12  ;;  %v60_v21 = vand.u32 2147483647, %v2444_v18  ;;  %v102_v23 = vld [vmem:[%s2846_s1 + $0x48] sm:$0xff]  ;;  %v2453_v29 = vld [vmem:[#allocation2 + $0x20] sm:$0xff]  ;;  %v103_v32 = vld [vmem:[%s2846_s1 + $0x50] sm:$0xff] }
  0x2b   :  { %v62_v20 = vsub.f32 0.0, %v58_v15  ;;  %v63_v25 = vsub.f32 0.0, %v59_v17  ;;  %v1901_v30 = vpack.c.bf16 %v102_v23, %v101_v22  ;;  %v104_v33 = vld [vmem:[%s2846_s1 + $0x58] sm:$0xff]  ;;  %v374_v34 = vand.u32 2147483647, %v2453_v29  ;;  %v2462_v37 = vld [vmem:[#allocation2 + $0x28] sm:$0xff] }
  0x2c   :  { %v65_v24 = vmul.f32 1.442695, %v61_v16  ;;  %v64_v27 = vsub.f32 0.0, %v60_v21  ;;  %v1905_v36 = vpack.c.bf16 %v104_v33, %v103_v32  ;;  %v105_v38 = vld [vmem:[%s2846_s1 + $0x60] sm:$0xff]  ;;  %v106_v39 = vld [vmem:[%s2846_s1 + $0x68] sm:$0xff]  ;;  %v2470_v41 = vld [vmem:[#allocation2 + $0x30] sm:$0xff] }
  0x2d   :  { %1892 = vmatpush3.bf16.msra.mxu0 %v1889_v5  ;;  %v67_v26 = vmul.f32 1.442695, %v62_v20  ;;  %v69_v28 = vmul.f32 1.442695, %v63_v25  ;;  %v378_v35 = vsub.f32 0.0, %v374_v34  ;;  %v1909_v43 = vpack.c.bf16 %v106_v39, %v105_v38  ;;  %v107_v45 = vld [vmem:[%s2846_s1 + $0x70] sm:$0xff] }
  0x2e   :  { %1894 = vmatprep.subr.bf16.mxu0 %v1893_v8  ;;  %2201 = vpow2.f32 %v65_v24  ;;  %v71_v31 = vmul.f32 1.442695, %v64_v27  ;;  %v375_v42 = vand.u32 2147483647, %v2462_v37  ;;  %v108_v46 = vld [vmem:[%s2846_s1 + $0x78] sm:$0xff]  ;;  %v1286_v58 = vld [vmem:[%s2846_s1 + $0x80] sm:$0xff] }
  0x2f   :  { %2203 = vpow2.f32 %v67_v26  ;;  %v382_v40 = vmul.f32 1.442695, %v378_v35  ;;  %v376_v47 = vand.u32 2147483647, %v2470_v41  ;;  %v2480_v48 = vld [vmem:[#allocation2 + $0x38] sm:$0xff]  ;;  %v1913_v55 = vpack.c.bf16 %v108_v46, %v107_v45  ;;  %v1287_v59 = vld [vmem:[%s2846_s1 + $0x88] sm:$0xff] }
  0x30   :  { %2205 = vpow2.f32 %v69_v28  ;;  %v379_v53 = vsub.f32 0.0, %v375_v42  ;;  %v377_v57 = vand.u32 2147483647, %v2480_v48  ;;  %v1949_v63 = vpack.c.bf16 %v1287_v59, %v1286_v58  ;;  %v1290_v28 = vld [vmem:[%s2846_s1 + $0xa0] sm:$0xff]  ;;  %v1292_v38 = vld [vmem:[%s2846_s1 + $0xb0] sm:$0xff]  ;;  %v1293_v39 = vld [vmem:[%s2846_s1 + $0xb8] sm:$0xff] }
  0x31   :  { %1896 = vmatpush3.bf16.msra.mxu0 %v1893_v8  ;;  %2207 = vpow2.f32 %v71_v31  ;;  %v380_v61 = vsub.f32 0.0, %v376_v47  ;;  %v53_v5 = vmax.f32 %v2432_v10, 0.0  ;;  %v54_v7 = vmax.f32 %v2438_v13, 0.0  ;;  %v1288_v10 = vld [vmem:[%s2846_s1 + $0x90] sm:$0xff]  ;;  %v1289_v13 = vld [vmem:[%s2846_s1 + $0x98] sm:$0xff]  ;;  %v1294_v46 = vld [vmem:[%s2846_s1 + $0xc0] sm:$0xff] }
  0x32   :  { %1898 = vmatprep.subr.bf16.mxu0 %v1897_v19  ;;  %2209 = vpow2.f32 %v382_v40  ;;  %v384_v62 = vmul.f32 1.442695, %v379_v53  ;;  %v381_v0 = vsub.f32 0.0, %v377_v57  ;;  %v55_v11 = vmax.f32 %v2440_v14, 0.0  ;;  %v1295_v47 = vld [vmem:[%s2846_s1 + $0xc8] sm:$0xff]  ;;  %v1300_v59 = vld [vmem:[%s2846_s1 + $0xf0] sm:$0xff] }
  0x33   :  { %v386_v2 = vmul.f32 1.442695, %v380_v61  ;;  %v56_v16 = vmax.f32 %v2444_v18, 0.0  ;;  %v1953_v25 = vpack.c.bf16 %v1289_v13, %v1288_v10  ;;  %v370_v31 = vmax.f32 %v2453_v29, 0.0  ;;  %v244_v10 = vld [vmem:[#allocation4 + $0x30] sm:$0xff]  ;;  %v245_v13 = vld [vmem:[#allocation4 + $0x38] sm:$0xff] }
  0x34   :  { %v388_v4 = vmul.f32 1.442695, %v381_v0  ;;  %v1961_v45 = vpack.c.bf16 %v1293_v39, %v1292_v38  ;;  %v371_v61 = vmax.f32 %v2462_v37, 0.0  ;;  %v372_v0 = vmax.f32 %v2470_v41, 0.0  ;;  %v239_v41 = vld [vmem:[#allocation4 + $0x8] sm:$0xff] }
  0x35   :  { %1900 = vmatpush3.bf16.msra.mxu0 %v1897_v19 }
  0x36   :  { %1902 = vmatprep.subr.bf16.mxu0 %v1901_v30 }
  0x38   :  { %v2202_v44 = vpop.eup %2201 }
  0x39   :  { %1904 = vmatpush3.bf16.msra.mxu0 %v1901_v30  ;;  %v2204_v49 = vpop.eup %2203  ;;  %v73_v50 = vadd.f32 1.0, %v2202_v44  ;;  %v1291_v30 = vld [vmem:[%s2846_s1 + $0xa8] sm:$0xff] }
  0x3a   :  { %1906 = vmatprep.subr.bf16.mxu0 %v1905_v36  ;;  %v2206_v51 = vpop.eup %2205  ;;  %v74_v52 = vadd.f32 1.0, %v2204_v49 }
  0x3b   :  { %v2208_v54 = vpop.eup %2207  ;;  %2211 = vlog2.f32 %v73_v50  ;;  %v75_v56 = vadd.f32 1.0, %v2206_v51  ;;  %v1965_v50 = vpack.c.bf16 %v1295_v47, %v1294_v46  ;;  %v1296_v51 = vld [vmem:[%s2846_s1 + $0xd0] sm:$0xff] }
  0x3c   :  { %2213 = vlog2.f32 %v74_v52  ;;  %v76_v60 = vadd.f32 1.0, %v2208_v54  ;;  %v2210_v1 = vpop.eup %2209  ;;  %v1297_v52 = vld [vmem:[%s2846_s1 + $0xd8] sm:$0xff]  ;;  %v1298_v54 = vld [vmem:[%s2846_s1 + $0xe0] sm:$0xff] }
  0x3d   :  { %1908 = vmatpush3.bf16.msra.mxu0 %v1905_v36  ;;  %2215 = vlog2.f32 %v75_v56  ;;  %v390_v3 = vadd.f32 1.0, %v2210_v1  ;;  %v1957_v36 = vpack.c.bf16 %v1291_v30, %v1290_v28  ;;  %v1969_v53 = vpack.c.bf16 %v1297_v52, %v1296_v51  ;;  %v252_v30 = vld [vmem:[#allocation4 + $0x70] sm:$0xff] }
  0x3e   :  { %1910 = vmatprep.subr.bf16.mxu0 %v1909_v43  ;;  %2217 = vlog2.f32 %v76_v60  ;;  %v1301_v60 = vld [vmem:[%s2846_s1 + $0xf8] sm:$0xff] }
  0x3f   :  { %2219 = vpow2.f32 %v384_v62 }
  0x40   :  { %2221 = vlog2.f32 %v390_v3 }
  0x41   :  { %1912 = vmatpush3.bf16.msra.mxu0 %v1909_v43  ;;  %2223 = vpow2.f32 %v386_v2  ;;  %v1977_v2 = vpack.c.bf16 %v1301_v60, %v1300_v59 }
  0x42   :  { %1914 = vmatprep.subr.bf16.mxu0 %v1913_v55  ;;  %2225 = vpow2.f32 %v388_v4  ;;  %v373_v4 = vmax.f32 %v2480_v48, 0.0 }
  0x45   :  { %1916 = vmatpush3.bf16.msra.mxu0 %v1913_v55  ;;  %v2212_v6 = vpop.eup %2211  ;;  %v1299_v55 = vld [vmem:[%s2846_s1 + $0xe8] sm:$0xff] }
  0x46   :  { %1950 = vmatprep.subr.bf16.mxu0 %v1949_v63  ;;  %v2214_v8 = vpop.eup %2213  ;;  %v78_v9 = vmul.f32 0.6931472, %v2212_v6  ;;  %v1973_v58 = vpack.c.bf16 %v1299_v55, %v1298_v54 }
  0x47   :  { %v2216_v12 = vpop.eup %2215  ;;  %v80_v15 = vmul.f32 0.6931472, %v2214_v8 }
  0x48   :  { %v2218_v17 = vpop.eup %2217  ;;  %v85_v19 = vadd.f32 %v78_v9, %v53_v5  ;;  %v82_v20 = vmul.f32 0.6931472, %v2216_v12 }
  0x49   :  { %v86_v21 = vadd.f32 %v80_v15, %v54_v7  ;;  %v84_v22 = vmul.f32 0.6931472, %v2218_v17  ;;  %v2220_v18 = vpop.eup %2219  ;;  %v240_v15 = vld [vmem:[#allocation4 + $0x10] sm:$0xff]  ;;  %v242_v17 = vld [vmem:[#allocation4 + $0x20] sm:$0xff] }
  0x4a   :  { %v1273_v23 = vadd.f32 -0.6931472, %v85_v19  ;;  %v87_v14 = vadd.f32 %v82_v20, %v55_v11  ;;  %v2222_v32 = vpop.eup %2221  ;;  %v391_v42 = vadd.f32 1.0, %v2220_v18  ;;  %v238_v11 = vld [vmem:[#allocation4] sm:$0xff]  ;;  %v243_v19 = vld [vmem:[#allocation4 + $0x28] sm:$0xff] }
  0x4b   :  { %v1274_v24 = vadd.f32 -0.6931472, %v86_v21  ;;  %v88_v26 = vadd.f32 %v84_v22, %v56_v16  ;;  %v2224_v34 = vpop.eup %2223  ;;  %v395_v35 = vmul.f32 0.6931472, %v2222_v32  ;;  %v1917_v12 = vpack.c.bf16 %v239_v41, %v238_v11  ;;  %v241_v16 = vld [vmem:[#allocation4 + $0x18] sm:$0xff]  ;;  %v246_v22 = vld [vmem:[#allocation4 + $0x40] sm:$0xff] }
  0x4c   :  { %1575 = vmatprep.mubr.f32.mxu0 %v1273_v23  ;;  %v1275_v27 = vadd.f32 -0.6931472, %v87_v14  ;;  %v2226_v29 = vpop.eup %2225  ;;  %v392_v43 = vadd.f32 1.0, %v2224_v34  ;;  %2227 = vlog2.f32 %v391_v42  ;;  %v1921_v48 = vpack.c.bf16 %v241_v16, %v240_v15  ;;  %v247_v23 = vld [vmem:[#allocation4 + $0x48] sm:$0xff]  ;;  %v250_v18 = vld [vmem:[#allocation4 + $0x60] sm:$0xff]  ;;  %v559_v15 = vld [vmem:[#allocation4 + $0x90] sm:$0xff] }
  0x4d   :  { %1576 = vmatmul.mubr.f32.vlgmr.msra.gmra.mrb[0].mxu0 %v1274_v24  ;;  %v1276_v33 = vadd.f32 -0.6931472, %v88_v26  ;;  %v402_v40 = vadd.f32 %v395_v35, %v370_v31  ;;  %v393_v49 = vadd.f32 1.0, %v2226_v29  ;;  %1918 = vmatprep.subr.bf16.mxu1 %v1917_v12  ;;  %v1925_v20 = vpack.c.bf16 %v243_v19, %v242_v17  ;;  %v248_v24 = vld [vmem:[#allocation4 + $0x50] sm:$0xff]  ;;  %v253_v31 = vld [vmem:[#allocation4 + $0x78] sm:$0xff]  ;;  %v558_v34 = vld [vmem:[#allocation4 + $0x88] sm:$0xff] }
  0x4e   :  { %1952 = vmatpush3.bf16.msra.mxu0 %v1949_v63  ;;  %1578 = vmatprep.mubr.f32.mxu0 %v1275_v27  ;;  %2229 = vlog2.f32 %v392_v43  ;;  %v1929_v21 = vpack.c.bf16 %v245_v13, %v244_v10  ;;  %v1933_v14 = vpack.c.bf16 %v247_v23, %v246_v22  ;;  %v251_v27 = vld [vmem:[#allocation4 + $0x68] sm:$0xff]  ;;  %v1945_v32 = vpack.c.bf16 %v253_v31, %v252_v30  ;;  %v560_v16 = vld [vmem:[#allocation4 + $0x98] sm:$0xff] }
  0x4f   :  { %1954 = vmatprep.subr.bf16.mxu0 %v1953_v25  ;;  %v1282_v44 = vadd.f32 -0.6931472, %v402_v40  ;;  %2231 = vlog2.f32 %v393_v49  ;;  %1920 = vmatpush3.bf16.msra.mxu1 %v1917_v12  ;;  %v1941_v28 = vpack.c.bf16 %v251_v27, %v250_v18  ;;  %v2550_v40 = vld [vmem:[%s2848_s3] sm:$0x3] }
  0x50   :  { %1922 = vmatprep.subr.bf16.mxu1 %v1921_v48 }
  0x51   :  { %1579 = vmatmul.mubr.f32.gmra.mrb[2].mxu0 %v1276_v33  ;;  %v557_v33 = vld [vmem:[#allocation4 + $0x80] sm:$0xff] }
  0x52   :  { %1956 = vmatpush3.bf16.msra.mxu0 %v1953_v25  ;;  %1651 = vmatprep.mubr.f32.mxu0 %v1282_v44  ;;  %v249_v25 = vld [vmem:[#allocation4 + $0x58] sm:$0xff]  ;;  %v2539_v35 = vpack.c.bf16 %v558_v34, %v557_v33 }
  0x53   :  { %1958 = vmatprep.subr.bf16.mxu0 %v1957_v36  ;;  %1924 = vmatpush3.bf16.msra.mxu1 %v1921_v48  ;;  %v1937_v26 = vpack.c.bf16 %v249_v25, %v248_v24  ;;  %v1985_v25 = vpack.c.bf16 %v560_v16, %v559_v15  ;;  %v567_v15 = vld [vmem:[#allocation4 + $0xd0] sm:$0xff]  ;;  %v568_v16 = vld [vmem:[#allocation4 + $0xd8] sm:$0xff] }
  0x54   :  { %1926 = vmatprep.subr.bf16.mxu1 %v1925_v20 }
  0x56   :  { %1960 = vmatpush3.bf16.msra.mxu0 %v1957_v36  ;;  %v2228_v56 = vpop.eup %2227  ;;  %v109_v36 = vlaneseq }
  0x57   :  { %1962 = vmatprep.subr.bf16.mxu0 %v1961_v45  ;;  %v397_v62 = vmul.f32 0.6931472, %v2228_v56  ;;  %1928 = vmatpush3.bf16.msra.mxu1 %v1925_v20 }
  0x58   :  { %v2230_v57 = vpop.eup %2229  ;;  %1930 = vmatprep.subr.bf16.mxu1 %v1929_v21  ;;  %v2542_v38 = vshrl.u32 %v109_v36, 7 }
  0x59   :  { %v2232_v63 = vpop.eup %2231  ;;  %v399_v1 = vmul.f32 0.6931472, %v2230_v57  ;;  %v403_v3 = vadd.f32 %v397_v62, %v371_v61 }
  0x5a   :  { %1964 = vmatpush3.bf16.msra.mxu0 %v1961_v45  ;;  %v401_v5 = vmul.f32 0.6931472, %v2232_v63  ;;  %v2545_v39 = vsub.s32 0, %v2542_v38 }
  0x5b   :  { %1966 = vmatprep.subr.bf16.mxu0 %v1965_v50  ;;  %v404_v6 = vadd.f32 %v399_v1, %v372_v0  ;;  %v1283_v7 = vadd.f32 -0.6931472, %v403_v3  ;;  %1932 = vmatpush3.bf16.msra.mxu1 %v1929_v21  ;;  %v2560_v3 = vld [vmem:[#allocation2 + $0x40] sm:$0xff] }
  0x5c   :  { %v405_v8 = vadd.f32 %v401_v5, %v373_v4  ;;  %1934 = vmatprep.subr.bf16.mxu1 %v1933_v14  ;;  %v112_v42 = vrot.slane %v2550_v40, %v2545_v39 }
  0x5d   :  { %v1284_v9 = vadd.f32 -0.6931472, %v404_v6 }
  0x5e   :  { %1968 = vmatpush3.bf16.msra.mxu0 %v1965_v50  ;;  %v1285_v37 = vadd.f32 -0.6931472, %v405_v8 }
  0x5f   :  { %1970 = vmatprep.subr.bf16.mxu0 %v1969_v53  ;;  %1936 = vmatpush3.bf16.msra.mxu1 %v1933_v14 }
  0x60   :  { %1938 = vmatprep.subr.bf16.mxu1 %v1937_v26 }
  0x62   :  { %1972 = vmatpush3.bf16.msra.mxu0 %v1969_v53 }
  0x63   :  { %1974 = vmatprep.subr.bf16.mxu0 %v1973_v58  ;;  %1940 = vmatpush3.bf16.msra.mxu1 %v1937_v26 }
  0x64   :  { %1942 = vmatprep.subr.bf16.mxu1 %v1941_v28 }
  0x66   :  { %1976 = vmatpush3.bf16.msra.mxu0 %v1973_v58 }
  0x67   :  { %1978 = vmatprep.subr.bf16.mxu0 %v1977_v2  ;;  %1944 = vmatpush3.bf16.msra.mxu1 %v1941_v28 }
  0x68   :  { %1946 = vmatprep.subr.bf16.mxu1 %v1945_v32 }
  0x6a   :  { %1980 = vmatpush3.bf16.msra.mxu0 %v1977_v2 }
  0x6b   :  { %1948 = vmatpush3.bf16.msra.mxu1 %v1945_v32 }
  0x6c   :  { %1982 = vmatprep.subr.bf16.mxu1 %v2539_v35 }
  0x6d   :  { %1652 = vmatmul.mubr.f32.vlgmr.msra.gmra.mrb[4].mxu0 %v1283_v7  ;;  %v864_v7 = vand.u32 2147483647, %v2560_v3 }
  0x6e   :  { %1654 = vmatprep.mubr.f32.mxu0 %v1284_v9  ;;  %v2566_v9 = vld [vmem:[%s2848_s3 + $0x2] sm:$0x3] }
  0x6f   :  { %v430_v11 = vrot.slane %v2566_v9, %v2545_v39 }
  0x71   :  { %1655 = vmatmul.mubr.f32.gmra.mrb[6].mxu0 %v1285_v37  ;;  %v868_v37 = vsub.f32 0.0, %v864_v7  ;;  %v2587_v7 = vld [vmem:[#allocation2 + $0x50] sm:$0xff] }
  0x73   :  { %v872_v48 = vmul.f32 1.442695, %v868_v37 }
 0x120   :  { %v1577_v29 = vpop.f32.mrb[0].mxu0 }
 0x121   :  { %v185_v43 = vadd.f32 %v1577_v29, %v112_v42  ;;  %v179_v44 = vpop.f32.mrb[1].mxu0 }
 0x122   :  { %v180_v45 = vadd.f32 %v179_v44, %v112_v42 }
 0x123   :  { %v203_v46 = vand.u32 2147483647, %v185_v43  ;;  %v199_v19 = vmax.f32 %v185_v43, 0.0 }
 0x124   :  { %v202_v47 = vand.u32 2147483647, %v180_v45  ;;  %v1580_v49 = vpop.f32.mrb[2].mxu0  ;;  %v198_v22 = vmax.f32 %v180_v45, 0.0 }
 0x125   :  { %v207_v50 = vsub.f32 0.0, %v203_v46  ;;  %v2554_v51 = vadd.f32 %v1580_v49, %v112_v42  ;;  %v189_v52 = vpop.f32.mrb[3].mxu0 }
 0x126   :  { %v206_v53 = vsub.f32 0.0, %v202_v47  ;;  %v2556_v54 = vadd.f32 %v189_v52, %v112_v42 }
 0x127   :  { %v212_v55 = vmul.f32 1.442695, %v207_v50  ;;  %v205_v56 = vand.u32 2147483647, %v2554_v51  ;;  %v201_v18 = vmax.f32 %v2554_v51, 0.0 }
 0x128   :  { %v210_v57 = vmul.f32 1.442695, %v206_v53  ;;  %v204_v58 = vand.u32 2147483647, %v2556_v54  ;;  %v200_v32 = vmax.f32 %v2556_v54, 0.0  ;;  %v561_v54 = vld [vmem:[#allocation4 + $0xa0] sm:$0xff] }
 0x129   :  { %2233 = vpow2.f32 %v212_v55  ;;  %v209_v59 = vsub.f32 0.0, %v205_v56  ;;  %v562_v55 = vld [vmem:[#allocation4 + $0xa8] sm:$0xff] }
 0x12a   :  { %2235 = vpow2.f32 %v210_v57  ;;  %v208_v60 = vsub.f32 0.0, %v204_v58 }
 0x12b   :  { %v216_v61 = vmul.f32 1.442695, %v209_v59 }
 0x12c   :  { %v214_v62 = vmul.f32 1.442695, %v208_v60 }
 0x12d   :  { %2237 = vpow2.f32 %v216_v61  ;;  %v1989_v61 = vpack.c.bf16 %v562_v55, %v561_v54  ;;  %v860_v54 = vmax.f32 %v2560_v3, 0.0 }
 0x12e   :  { %2239 = vpow2.f32 %v214_v62 }
 0x133   :  { %v2234_v63 = vpop.eup %2233 }
 0x134   :  { %v2236_v0 = vpop.eup %2235  ;;  %v219_v1 = vadd.f32 1.0, %v2234_v63  ;;  %v563_v63 = vld [vmem:[#allocation4 + $0xb0] sm:$0xff] }
 0x135   :  { %v218_v2 = vadd.f32 1.0, %v2236_v0  ;;  %v564_v0 = vld [vmem:[#allocation4 + $0xb8] sm:$0xff] }
 0x136   :  { %2241 = vlog2.f32 %v219_v1 }
 0x137   :  { %v2238_v4 = vpop.eup %2237  ;;  %2243 = vlog2.f32 %v218_v2  ;;  %v1993_v2 = vpack.c.bf16 %v564_v0, %v563_v63 }
 0x138   :  { %v2240_v5 = vpop.eup %2239  ;;  %v221_v6 = vadd.f32 1.0, %v2238_v4  ;;  %v565_v4 = vld [vmem:[#allocation4 + $0xc0] sm:$0xff] }
 0x139   :  { %v220_v8 = vadd.f32 1.0, %v2240_v5  ;;  %v566_v5 = vld [vmem:[#allocation4 + $0xc8] sm:$0xff] }
 0x13a   :  { %2245 = vlog2.f32 %v221_v6  ;;  %v2585_v6 = vld [vmem:[#allocation2 + $0x48] sm:$0xff]  ;;  %v1997_v37 = vpack.c.bf16 %v566_v5, %v565_v4 }
 0x13b   :  { %2247 = vlog2.f32 %v220_v8 }
 0x13c   :  { %2249 = vpow2.f32 %v872_v48  ;;  %v866_v48 = vand.u32 2147483647, %v2587_v7 }
 0x140   :  { %v2242_v41 = vpop.eup %2241  ;;  %v1653_v12 = vpop.f32.mrb[4].mxu0 }
 0x141   :  { %v2244_v17 = vpop.eup %2243  ;;  %v2570_v20 = vadd.f32 %v1653_v12, %v430_v11  ;;  %v497_v10 = vpop.f32.mrb[5].mxu0  ;;  %v225_v13 = vmul.f32 0.6931472, %v2242_v41 }
 0x142   :  { %v2572_v21 = vadd.f32 %v497_v10, %v430_v11  ;;  %v223_v23 = vmul.f32 0.6931472, %v2244_v17  ;;  %v2591_v17 = vld [vmem:[#allocation2 + $0x58] sm:$0xff] }
 0x143   :  { %v521_v14 = vand.u32 2147483647, %v2570_v20  ;;  %v231_v24 = vadd.f32 %v225_v13, %v199_v19  ;;  %v2001_v13 = vpack.c.bf16 %v568_v16, %v567_v15 }
 0x144   :  { %v2246_v26 = vpop.eup %2245  ;;  %v520_v27 = vand.u32 2147483647, %v2572_v21  ;;  %v1656_v28 = vpop.f32.mrb[6].mxu0  ;;  %v230_v30 = vadd.f32 %v223_v23, %v198_v22  ;;  %v867_v23 = vand.u32 2147483647, %v2591_v17 }
 0x145   :  { %v2248_v31 = vpop.eup %2247  ;;  %v525_v33 = vsub.f32 0.0, %v521_v14  ;;  %v2578_v34 = vadd.f32 %v1656_v28, %v430_v11  ;;  %v507_v36 = vpop.f32.mrb[7].mxu0  ;;  %v229_v42 = vmul.f32 0.6931472, %v2246_v26  ;;  %v1278_v49 = vadd.f32 -0.6931472, %v231_v24 }
 0x146   :  { %v524_v29 = vsub.f32 0.0, %v520_v27  ;;  %v2580_v43 = vadd.f32 %v507_v36, %v430_v11  ;;  %v1277_v44 = vadd.f32 -0.6931472, %v230_v30  ;;  %v227_v45 = vmul.f32 0.6931472, %v2248_v31  ;;  %v2250_v1 = vpop.eup %2249  ;;  %v570_v26 = vld [vmem:[#allocation4 + $0xe8] sm:$0xff] }
 0x147   :  { %v530_v46 = vmul.f32 1.442695, %v525_v33  ;;  %v523_v47 = vand.u32 2147483647, %v2578_v34  ;;  %v233_v50 = vadd.f32 %v229_v42, %v201_v18  ;;  %v865_v11 = vand.u32 2147483647, %v2585_v6 }
 0x148   :  { %v528_v51 = vmul.f32 1.442695, %v524_v29  ;;  %v522_v52 = vand.u32 2147483647, %v2580_v43  ;;  %1613 = vmatprep.mubr.f32.mxu1 %v1277_v44  ;;  %v232_v53 = vadd.f32 %v227_v45, %v200_v32  ;;  %v870_v18 = vsub.f32 0.0, %v866_v48  ;;  %v571_v32 = vld [vmem:[#allocation4 + $0xf0] sm:$0xff] }
 0x149   :  { %2251 = vpow2.f32 %v530_v46  ;;  %v527_v56 = vsub.f32 0.0, %v523_v47  ;;  %1614 = vmatmul.mubr.f32.vlgmr.msra.gmra.mrb[0].mxu1 %v1278_v49  ;;  %v1280_v60 = vadd.f32 -0.6931472, %v233_v50  ;;  %v869_v22 = vsub.f32 0.0, %v865_v11  ;;  %v572_v33 = vld [vmem:[#allocation4 + $0xf8] sm:$0xff]  ;;  %v1327_v46 = vld [vmem:[%s2846_s1 + $0x100] sm:$0xff] }
 0x14a   :  { %2253 = vpow2.f32 %v528_v51  ;;  %v526_v57 = vsub.f32 0.0, %v522_v52  ;;  %1984 = vmatpush3.bf16.msra.mxu1 %v2539_v35  ;;  %v1279_v58 = vadd.f32 -0.6931472, %v232_v53  ;;  %v880_v35 = vadd.f32 1.0, %v2250_v1  ;;  %v1328_v47 = vld [vmem:[%s2846_s1 + $0x108] sm:$0xff]  ;;  %v1333_v48 = vld [vmem:[%s2846_s1 + $0x130] sm:$0xff] }
 0x14b   :  { %v534_v59 = vmul.f32 1.442695, %v527_v56  ;;  %1986 = vmatprep.subr.bf16.mxu1 %v1985_v25  ;;  %v874_v30 = vmul.f32 1.442695, %v869_v22  ;;  %v871_v31 = vsub.f32 0.0, %v867_v23  ;;  %v2009_v29 = vpack.c.bf16 %v572_v33, %v571_v32 }
 0x14c   :  { %v532_v62 = vmul.f32 1.442695, %v526_v57  ;;  %1616 = vmatprep.mubr.f32.mxu1 %v1279_v58  ;;  %v876_v36 = vmul.f32 1.442695, %v870_v18  ;;  %v517_v50 = vmax.f32 %v2570_v20, 0.0  ;;  %v516_v52 = vmax.f32 %v2572_v21, 0.0 }
 0x14d   :  { %2255 = vpow2.f32 %v534_v59  ;;  %1617 = vmatmul.mubr.f32.gmra.mrb[2].mxu1 %v1280_v60  ;;  %v878_v44 = vmul.f32 1.442695, %v871_v31  ;;  %v2077_v57 = vpack.c.bf16 %v1328_v47, %v1327_v46  ;;  %v1329_v60 = vld [vmem:[%s2846_s1 + $0x110] sm:$0xff]  ;;  %v1330_v20 = vld [vmem:[%s2846_s1 + $0x118] sm:$0xff]  ;;  %v518_v63 = vmax.f32 %v2580_v43, 0.0  ;;  %v1340_v31 = vld [vmem:[%s2846_s1 + $0x168] sm:$0xff] }
 0x14e   :  { %2257 = vpow2.f32 %v532_v62  ;;  %1988 = vmatpush3.bf16.msra.mxu1 %v1985_v25  ;;  %v569_v25 = vld [vmem:[#allocation4 + $0xe0] sm:$0xff]  ;;  %v1337_v18 = vld [vmem:[%s2846_s1 + $0x150] sm:$0xff]  ;;  %v862_v47 = vmax.f32 %v2587_v7, 0.0 }
 0x14f   :  { %1990 = vmatprep.subr.bf16.mxu1 %v1989_v61  ;;  %2259 = vlog2.f32 %v880_v35  ;;  %v2005_v28 = vpack.c.bf16 %v570_v26, %v569_v25  ;;  %v2081_v35 = vpack.c.bf16 %v1330_v20, %v1329_v60  ;;  %v1307_v60 = vld [vmem:[%s2849_s4 + $0x88] sm:$0xff] }
 0x152   :  { %1992 = vmatpush3.bf16.msra.mxu1 %v1989_v61  ;;  %v519_v61 = vmax.f32 %v2578_v34, 0.0  ;;  %v1332_v34 = vld [vmem:[%s2846_s1 + $0x128] sm:$0xff] }
 0x153   :  { %v2252_v8 = vpop.eup %2251  ;;  %1994 = vmatprep.subr.bf16.mxu1 %v1993_v2 }
 0x154   :  { %v2254_v41 = vpop.eup %2253  ;;  %v537_v12 = vadd.f32 1.0, %v2252_v8 }
 0x155   :  { %v536_v19 = vadd.f32 1.0, %v2254_v41 }
 0x156   :  { %2261 = vlog2.f32 %v537_v12  ;;  %1996 = vmatpush3.bf16.msra.mxu1 %v1993_v2 }
 0x157   :  { %v2256_v10 = vpop.eup %2255  ;;  %2263 = vlog2.f32 %v536_v19  ;;  %1998 = vmatprep.subr.bf16.mxu1 %v1997_v37  ;;  %v1334_v19 = vld [vmem:[%s2846_s1 + $0x138] sm:$0xff] }
 0x158   :  { %v2258_v14 = vpop.eup %2257  ;;  %v539_v24 = vadd.f32 1.0, %v2256_v10  ;;  %v2089_v23 = vpack.c.bf16 %v1334_v19, %v1333_v48  ;;  %v1321_v48 = vld [vmem:[%s2849_s4 + $0xf8] sm:$0xff] }
 0x159   :  { %v538_v27 = vadd.f32 1.0, %v2258_v14  ;;  %v2260_v42 = vpop.eup %2259  ;;  %v1335_v14 = vld [vmem:[%s2846_s1 + $0x140] sm:$0xff] }
 0x15a   :  { %2265 = vlog2.f32 %v539_v24  ;;  %2000 = vmatpush3.bf16.msra.mxu1 %v1997_v37  ;;  %v885_v55 = vmul.f32 0.6931472, %v2260_v42  ;;  %v1331_v37 = vld [vmem:[%s2846_s1 + $0x120] sm:$0xff]  ;;  %v1336_v24 = vld [vmem:[%s2846_s1 + $0x148] sm:$0xff]  ;;  %v1341_v42 = vld [vmem:[%s2846_s1 + $0x170] sm:$0xff] }
 0x15b   :  { %2267 = vlog2.f32 %v538_v27  ;;  %2002 = vmatprep.subr.bf16.mxu1 %v2001_v13  ;;  %v2085_v16 = vpack.c.bf16 %v1332_v34, %v1331_v37  ;;  %v2093_v26 = vpack.c.bf16 %v1336_v24, %v1335_v14  ;;  %v1338_v27 = vld [vmem:[%s2846_s1 + $0x158] sm:$0xff]  ;;  %v1316_v34 = vld [vmem:[%s2849_s4 + $0xd0] sm:$0xff]  ;;  %v1048_v14 = vld [vmem:[#allocation4 + $0x108] sm:$0xff] }
 0x15c   :  { %2269 = vpow2.f32 %v874_v30  ;;  %v892_v2 = vadd.f32 %v885_v55, %v860_v54  ;;  %v1339_v30 = vld [vmem:[%s2846_s1 + $0x160] sm:$0xff] }
 0x15d   :  { %2271 = vpow2.f32 %v876_v36  ;;  %v2101_v36 = vpack.c.bf16 %v1340_v31, %v1339_v30  ;;  %v1053_v31 = vld [vmem:[#allocation4 + $0x130] sm:$0xff] }
 0x15e   :  { %2004 = vmatpush3.bf16.msra.mxu1 %v2001_v13  ;;  %2273 = vpow2.f32 %v878_v44  ;;  %v1323_v12 = vadd.f32 -0.6931472, %v892_v2  ;;  %v861_v44 = vmax.f32 %v2585_v6, 0.0  ;;  %v1312_v2 = vld [vmem:[%s2849_s4 + $0xb0] sm:$0xff] }
 0x15f   :  { %2006 = vmatprep.subr.bf16.mxu1 %v2005_v28 }
 0x160   :  { %v2262_v45 = vpop.eup %2261 }
 0x161   :  { %v2264_v49 = vpop.eup %2263  ;;  %v543_v51 = vmul.f32 0.6931472, %v2262_v45 }
 0x162   :  { %2008 = vmatpush3.bf16.msra.mxu1 %v2005_v28  ;;  %v541_v53 = vmul.f32 0.6931472, %v2264_v49  ;;  %v2097_v28 = vpack.c.bf16 %v1338_v27, %v1337_v18  ;;  %v1051_v27 = vld [vmem:[#allocation4 + $0x120] sm:$0xff] }
 0x163   :  { %v549_v56 = vadd.f32 %v543_v51, %v517_v50  ;;  %2010 = vmatprep.subr.bf16.mxu1 %v2009_v29 }
 0x164   :  { %v2266_v58 = vpop.eup %2265  ;;  %v548_v59 = vadd.f32 %v541_v53, %v516_v52  ;;  %v863_v52 = vmax.f32 %v2591_v17, 0.0 }
 0x165   :  { %v2268_v21 = vpop.eup %2267  ;;  %v547_v62 = vmul.f32 0.6931472, %v2266_v58  ;;  %v1303_v4 = vadd.f32 -0.6931472, %v549_v56 }
 0x166   :  { %2012 = vmatpush3.bf16.msra.mxu1 %v2009_v29  ;;  %v1302_v0 = vadd.f32 -0.6931472, %v548_v59  ;;  %v545_v1 = vmul.f32 0.6931472, %v2268_v21  ;;  %v2270_v11 = vpop.eup %2269  ;;  %v1342_v29 = vld [vmem:[%s2846_s1 + $0x178] sm:$0xff]  ;;  %v1306_v59 = vld [vmem:[%s2849_s4 + $0x80] sm:$0xff] }
 0x167   :  { %2078 = vmatprep.subr.bf16.mxu1 %v2077_v57  ;;  %v551_v5 = vadd.f32 %v547_v62, %v519_v61  ;;  %v2272_v43 = vpop.eup %2271  ;;  %v881_v10 = vadd.f32 1.0, %v2270_v11  ;;  %v2105_v50 = vpack.c.bf16 %v1342_v29, %v1341_v42  ;;  %v2013_v20 = vpack.c.bf16 %v1307_v60, %v1306_v59  ;;  %v1308_v21 = vld [vmem:[%s2849_s4 + $0x90] sm:$0xff]  ;;  %v1309_v61 = vld [vmem:[%s2849_s4 + $0x98] sm:$0xff]  ;;  %v1056_v42 = vld [vmem:[#allocation4 + $0x148] sm:$0xff] }
 0x168   :  { %1689 = vmatprep.mubr.f32.mxu1 %v1302_v0  ;;  %v550_v8 = vadd.f32 %v545_v1, %v518_v63  ;;  %v2274_v13 = vpop.eup %2273  ;;  %v882_v22 = vadd.f32 1.0, %v2272_v43  ;;  %v2017_v62 = vpack.c.bf16 %v1309_v61, %v1308_v21  ;;  %v1310_v63 = vld [vmem:[%s2849_s4 + $0xa0] sm:$0xff]  ;;  %v1311_v0 = vld [vmem:[%s2849_s4 + $0xa8] sm:$0xff]  ;;  %v1317_v11 = vld [vmem:[%s2849_s4 + $0xd8] sm:$0xff] }
 0x169   :  { %1690 = vmatmul.mubr.f32.vlgmr.msra.gmra.mrb[4].mxu1 %v1303_v4  ;;  %v1305_v15 = vadd.f32 -0.6931472, %v551_v5  ;;  %2275 = vlog2.f32 %v881_v10  ;;  %v883_v25 = vadd.f32 1.0, %v2274_v13  ;;  %2014 = vmatprep.subr.bf16.mxu0 %v2013_v20  ;;  %v2021_v1 = vpack.c.bf16 %v1311_v0, %v1310_v63  ;;  %v1313_v4 = vld [vmem:[%s2849_s4 + $0xb8] sm:$0xff]  ;;  %v347_v10 = vld [vmem:[%s2849_s4] sm:$0xff]  ;;  %v348_v13 = vld [vmem:[%s2849_s4 + $0x8] sm:$0xff] }
 0x16a   :  { %2080 = vmatpush3.bf16.msra.mxu1 %v2077_v57  ;;  %v1304_v41 = vadd.f32 -0.6931472, %v550_v8  ;;  %2277 = vlog2.f32 %v882_v22  ;;  %2016 = vmatpush3.bf16.msra.mxu0 %v2013_v20  ;;  %v2025_v5 = vpack.c.bf16 %v1313_v4, %v1312_v2  ;;  %v1315_v8 = vld [vmem:[%s2849_s4 + $0xc8] sm:$0xff]  ;;  %v2033_v43 = vpack.c.bf16 %v1317_v11, %v1316_v34  ;;  %v349_v63 = vld [vmem:[%s2849_s4 + $0x10] sm:$0xff]  ;;  %v2297_v0 = vld [vmem:[#allocation2 + $0x20] sm:$0xff] }
 0x16b   :  { %2082 = vmatprep.subr.bf16.mxu1 %v2081_v35  ;;  %2279 = vlog2.f32 %v883_v25  ;;  %2018 = vmatprep.subr.bf16.mxu0 %v2017_v62  ;;  %v2704_v22 = vpack.c.bf16 %v348_v13, %v347_v10  ;;  %v1049_v25 = vld [vmem:[#allocation4 + $0x110] sm:$0xff]  ;;  %v351_v34 = vld [vmem:[%s2849_s4 + $0x20] sm:$0xff]  ;;  %v352_v11 = vld [vmem:[%s2849_s4 + $0x28] sm:$0xff] }
 0x16c   :  { %1692 = vmatprep.mubr.f32.mxu1 %v1304_v41  ;;  %v1318_v41 = vld [vmem:[%s2849_s4 + $0xe0] sm:$0xff]  ;;  %v353_v10 = vld [vmem:[%s2849_s4 + $0x30] sm:$0xff]  ;;  %v354_v13 = vld [vmem:[%s2849_s4 + $0x38] sm:$0xff] }
 0x16d   :  { %1693 = vmatmul.mubr.f32.gmra.mrb[6].mxu1 %v1305_v15 }
 0x16e   :  { %2084 = vmatpush3.bf16.msra.mxu1 %v2081_v35  ;;  %1803 = vmatprep.mubr.f32.mxu1 %v1323_v12  ;;  %v1314_v35 = vld [vmem:[%s2849_s4 + $0xc0] sm:$0xff]  ;;  %v1319_v12 = vld [vmem:[%s2849_s4 + $0xe8] sm:$0xff] }
 0x16f   :  { %2086 = vmatprep.subr.bf16.mxu1 %v2085_v16  ;;  %2020 = vmatpush3.bf16.msra.mxu0 %v2017_v62  ;;  %v2029_v37 = vpack.c.bf16 %v1315_v8, %v1314_v35  ;;  %v2037_v15 = vpack.c.bf16 %v1319_v12, %v1318_v41  ;;  %v2300_v12 = vld [vmem:[#allocation2 + $0x38] sm:$0xff] }
 0x170   :  { %2022 = vmatprep.subr.bf16.mxu0 %v2021_v1 }
 0x172   :  { %2088 = vmatpush3.bf16.msra.mxu1 %v2085_v16  ;;  %v1320_v16 = vld [vmem:[%s2849_s4 + $0xf0] sm:$0xff] }
 0x173   :  { %2090 = vmatprep.subr.bf16.mxu1 %v2089_v23  ;;  %v2276_v32 = vpop.eup %2275  ;;  %2024 = vmatpush3.bf16.msra.mxu0 %v2021_v1  ;;  %v2041_v19 = vpack.c.bf16 %v1321_v48, %v1320_v16  ;;  %v2053_v16 = vpack.c.bf16 %v352_v11, %v351_v34  ;;  %v2301_v48 = vld [vmem:[#allocation2] sm:$0xff] }
 0x174   :  { %v2278_v33 = vpop.eup %2277  ;;  %v887_v45 = vmul.f32 0.6931472, %v2276_v32  ;;  %2026 = vmatprep.subr.bf16.mxu0 %v2025_v5  ;;  %v1054_v32 = vld [vmem:[#allocation4 + $0x138] sm:$0xff] }
 0x175   :  { %v2280_v46 = vpop.eup %2279  ;;  %v889_v49 = vmul.f32 0.6931472, %v2278_v33  ;;  %v2121_v33 = vpack.c.bf16 %v1054_v32, %v1053_v31  ;;  %v2763_v31 = vld [vmem:[%s2848_s3 + $0x4] sm:$0x3]  ;;  %v361_v32 = vld [vmem:[%s2849_s4 + $0x70] sm:$0xff] }
 0x176   :  { %2092 = vmatpush3.bf16.msra.mxu1 %v2089_v23  ;;  %v893_v51 = vadd.f32 %v887_v45, %v861_v44  ;;  %v891_v53 = vmul.f32 0.6931472, %v2280_v46  ;;  %v1047_v23 = vld [vmem:[#allocation4 + $0x100] sm:$0xff]  ;;  %v1057_v44 = vld [vmem:[#allocation4 + $0x150] sm:$0xff]  ;;  %v1058_v45 = vld [vmem:[#allocation4 + $0x158] sm:$0xff] }
 0x177   :  { %2094 = vmatprep.subr.bf16.mxu1 %v2093_v26  ;;  %v894_v54 = vadd.f32 %v889_v49, %v862_v47  ;;  %2028 = vmatpush3.bf16.msra.mxu0 %v2025_v5  ;;  %v2109_v24 = vpack.c.bf16 %v1048_v14, %v1047_v23  ;;  %v2129_v46 = vpack.c.bf16 %v1058_v45, %v1057_v44  ;;  %v1059_v47 = vld [vmem:[#allocation4 + $0x160] sm:$0xff]  ;;  %v1060_v49 = vld [vmem:[#allocation4 + $0x168] sm:$0xff] }
 0x178   :  { %v1324_v55 = vadd.f32 -0.6931472, %v893_v51  ;;  %v895_v56 = vadd.f32 %v891_v53, %v863_v52  ;;  %2030 = vmatprep.subr.bf16.mxu0 %v2029_v37  ;;  %v1061_v51 = vld [vmem:[#allocation4 + $0x170] sm:$0xff]  ;;  %v1062_v52 = vld [vmem:[#allocation4 + $0x178] sm:$0xff]  ;;  %v355_v23 = vld [vmem:[%s2849_s4 + $0x40] sm:$0xff] }
 0x179   :  { %v1325_v57 = vadd.f32 -0.6931472, %v894_v54  ;;  %v2137_v53 = vpack.c.bf16 %v1062_v52, %v1061_v51  ;;  %v356_v14 = vld [vmem:[%s2849_s4 + $0x48] sm:$0xff] }
 0x17a   :  { %2096 = vmatpush3.bf16.msra.mxu1 %v2093_v26  ;;  %v1326_v58 = vadd.f32 -0.6931472, %v895_v56  ;;  %v1050_v26 = vld [vmem:[#allocation4 + $0x118] sm:$0xff] }
 0x17b   :  { %2098 = vmatprep.subr.bf16.mxu1 %v2097_v28  ;;  %2032 = vmatpush3.bf16.msra.mxu0 %v2029_v37  ;;  %v2113_v18 = vpack.c.bf16 %v1050_v26, %v1049_v25  ;;  %v357_v25 = vld [vmem:[%s2849_s4 + $0x50] sm:$0xff]  ;;  %v358_v26 = vld [vmem:[%s2849_s4 + $0x58] sm:$0xff] }
 0x17c   :  { %2034 = vmatprep.subr.bf16.mxu0 %v2033_v43 }
 0x17e   :  { %2100 = vmatpush3.bf16.msra.mxu1 %v2097_v28  ;;  %v1052_v28 = vld [vmem:[#allocation4 + $0x128] sm:$0xff] }
 0x17f   :  { %2102 = vmatprep.subr.bf16.mxu1 %v2101_v36  ;;  %2036 = vmatpush3.bf16.msra.mxu0 %v2033_v43  ;;  %v2117_v30 = vpack.c.bf16 %v1052_v28, %v1051_v27  ;;  %v2299_v43 = vld [vmem:[#allocation2 + $0x30] sm:$0xff]  ;;  %v359_v27 = vld [vmem:[%s2849_s4 + $0x60] sm:$0xff]  ;;  %v360_v28 = vld [vmem:[%s2849_s4 + $0x68] sm:$0xff] }
 0x180   :  { %2038 = vmatprep.subr.bf16.mxu0 %v2037_v15 }
 0x182   :  { %2104 = vmatpush3.bf16.msra.mxu1 %v2101_v36  ;;  %v1055_v36 = vld [vmem:[#allocation4 + $0x140] sm:$0xff] }
 0x183   :  { %2106 = vmatprep.subr.bf16.mxu1 %v2105_v50  ;;  %2040 = vmatpush3.bf16.msra.mxu0 %v2037_v15  ;;  %v2125_v29 = vpack.c.bf16 %v1056_v42, %v1055_v36  ;;  %v920_v36 = vrot.slane %v2763_v31, %v2545_v39 }
 0x184   :  { %2042 = vmatprep.subr.bf16.mxu0 %v2041_v19 }
 0x186   :  { %2108 = vmatpush3.bf16.msra.mxu1 %v2105_v50  ;;  %v2133_v50 = vpack.c.bf16 %v1060_v49, %v1059_v47 }
 0x187   :  { %2044 = vmatpush3.bf16.msra.mxu0 %v2041_v19  ;;  %2110 = vmatprep.subr.bf16.mxu1 %v2109_v24 }
 0x188   :  { %2046 = vmatprep.subr.bf16.mxu0 %v2704_v22 }
 0x189   :  { %1804 = vmatmul.mubr.f32.vlgmr.msra.gmra.mrb[8].mxu1 %v1324_v55 }
 0x18a   :  { %1806 = vmatprep.mubr.f32.mxu1 %v1325_v57  ;;  %2112 = vmatpush3.bf16.msra.mxu1 %v2109_v24  ;;  %v2061_v24 = vpack.c.bf16 %v356_v14, %v355_v23 }
 0x18b   :  { %2114 = vmatprep.subr.bf16.mxu1 %v2113_v18 }
 0x18d   :  { %1807 = vmatmul.mubr.f32.gmra.mrb[10].mxu1 %v1326_v58  ;;  %v2714_v58 = vsub.s32 1, %v2542_v38  ;;  %v350_v38 = vld [vmem:[%s2849_s4 + $0x18] sm:$0xff] }
 0x18e   :  { %2116 = vmatpush3.bf16.msra.mxu1 %v2113_v18  ;;  %v2049_v8 = vpack.c.bf16 %v350_v38, %v349_v63  ;;  %v2065_v18 = vpack.c.bf16 %v358_v26, %v357_v25 }
 0x18f   :  { %2118 = vmatprep.subr.bf16.mxu1 %v2117_v30  ;;  %v576_v59 = vrot.slane %v2566_v9, %v2714_v58  ;;  %v2720_v61 = vrot.slane %v2550_v40, %v2714_v58  ;;  %v2298_v9 = vld [vmem:[#allocation2 + $0x28] sm:$0xff] }
 0x192   :  { %2120 = vmatpush3.bf16.msra.mxu1 %v2117_v30  ;;  %v2069_v30 = vpack.c.bf16 %v360_v28, %v359_v27 }
 0x193   :  { %2122 = vmatprep.subr.bf16.mxu1 %v2121_v33 }
 0x196   :  { %2124 = vmatpush3.bf16.msra.mxu1 %v2121_v33  ;;  %v362_v33 = vld [vmem:[%s2849_s4 + $0x78] sm:$0xff] }
 0x197   :  { %2126 = vmatprep.subr.bf16.mxu1 %v2125_v29  ;;  %v2073_v42 = vpack.c.bf16 %v362_v33, %v361_v32 }
 0x19a   :  { %2128 = vmatpush3.bf16.msra.mxu1 %v2125_v29 }
 0x19b   :  { %2130 = vmatprep.subr.bf16.mxu1 %v2129_v46 }
 0x19e   :  { %2132 = vmatpush3.bf16.msra.mxu1 %v2129_v46 }
 0x19f   :  { %2134 = vmatprep.subr.bf16.mxu1 %v2133_v50 }
 0x1a2   :  { %2136 = vmatpush3.bf16.msra.mxu1 %v2133_v50 }
 0x1a3   :  { %2138 = vmatprep.subr.bf16.mxu1 %v2137_v53 }
 0x1a6   :  { %2140 = vmatpush3.bf16.msra.mxu1 %v2137_v53  ;;  %v2302_v53 = vld [vmem:[#allocation2 + $0x8] sm:$0xff] }
 0x21c   :  { %v2707_v54 = vpop.f32.mrb[0].mxu1 }
 0x21d   :  { %v324_v55 = vpop.f32.mrb[1].mxu1  ;;  %v330_v44 = vadd.f32 %v2707_v54, %v2720_v61  ;;  %v2303_v54 = vld [vmem:[#allocation2 + $0x10] sm:$0xff] }
 0x21e   :  { %v325_v40 = vadd.f32 %v324_v55, %v2720_v61 }
 0x21f   :  { %v344_v55 = vadd.f32 %v2302_v53, %v330_v44  ;;  %v1349_v44 = vld [vmem:[%s2849_s4 + $0x110] sm:$0xff]  ;;  %v1354_v53 = vld [vmem:[%s2849_s4 + $0x138] sm:$0xff] }
 0x220   :  { %v2709_v56 = vpop.f32.mrb[2].mxu1  ;;  %v343_v19 = vadd.f32 %v2301_v48, %v325_v40 }
 0x221   :  { %v2711_v57 = vpop.f32.mrb[3].mxu1  ;;  %v340_v39 = vadd.f32 %v2709_v56, %v2720_v61 }
 0x222   :  { %v335_v47 = vadd.f32 %v2711_v57, %v2720_v61 }
 0x23c   :  { %v1691_v60 = vpop.f32.mrb[4].mxu1 }
 0x23d   :  { %v649_v20 = vadd.f32 %v1691_v60, %v576_v59  ;;  %v643_v21 = vpop.f32.mrb[5].mxu1 }
 0x23e   :  { %v644_v62 = vadd.f32 %v643_v21, %v576_v59  ;;  %v345_v21 = vadd.f32 %v2303_v54, %v335_v47  ;;  %v1358_v54 = vld [vmem:[%s2849_s4 + $0x158] sm:$0xff] }
 0x23f   :  { %v663_v4 = vadd.f32 %v2298_v9, %v649_v20 }
 0x240   :  { %v662_v1 = vadd.f32 %v2297_v0, %v644_v62  ;;  %v1694_v2 = vpop.f32.mrb[6].mxu1 }
 0x241   :  { %v659_v5 = vadd.f32 %v1694_v2, %v576_v59  ;;  %v653_v35 = vpop.f32.mrb[7].mxu1  ;;  %v2304_v2 = vld [vmem:[#allocation2 + $0x18] sm:$0xff] }
 0x242   :  { %v654_v37 = vadd.f32 %v653_v35, %v576_v59  ;;  %1727 = vmatprep.mubr.f32.mxu0 %v662_v1  ;;  %v346_v9 = vadd.f32 %v2304_v2, %v340_v39  ;;  %v1355_v39 = vld [vmem:[%s2849_s4 + $0x140] sm:$0xff] }
 0x243   :  { %1728 = vmatmul.mubr.f32.vlgmr.msra.gmra.mrb[8].mxu0 %v663_v4  ;;  %v665_v15 = vadd.f32 %v2300_v12, %v659_v5 }
 0x244   :  { %v664_v41 = vadd.f32 %v2299_v43, %v654_v37  ;;  %2048 = vmatpush3.bf16.msra.mxu0 %v2704_v22  ;;  %v2057_v22 = vpack.c.bf16 %v354_v13, %v353_v10 }
 0x245   :  { %2050 = vmatprep.subr.bf16.mxu0 %v2049_v8 }
 0x246   :  { %1730 = vmatprep.mubr.f32.mxu0 %v664_v41 }
 0x247   :  { %1731 = vmatmul.mubr.f32.gmra.mrb[10].mxu0 %v665_v15 }
 0x248   :  { %2052 = vmatpush3.bf16.msra.mxu0 %v2049_v8  ;;  %1765 = vmatprep.mubr.f32.mxu0 %v343_v19 }
 0x249   :  { %2054 = vmatprep.subr.bf16.mxu0 %v2053_v16 }
 0x24c   :  { %2056 = vmatpush3.bf16.msra.mxu0 %v2053_v16 }
 0x24d   :  { %2058 = vmatprep.subr.bf16.mxu0 %v2057_v22 }
 0x250   :  { %2060 = vmatpush3.bf16.msra.mxu0 %v2057_v22 }
 0x251   :  { %2062 = vmatprep.subr.bf16.mxu0 %v2061_v24 }
 0x254   :  { %2064 = vmatpush3.bf16.msra.mxu0 %v2061_v24 }
 0x255   :  { %2066 = vmatprep.subr.bf16.mxu0 %v2065_v18 }
 0x258   :  { %2068 = vmatpush3.bf16.msra.mxu0 %v2065_v18 }
 0x259   :  { %2070 = vmatprep.subr.bf16.mxu0 %v2069_v30 }
 0x25c   :  { %2072 = vmatpush3.bf16.msra.mxu0 %v2069_v30  ;;  %v1805_v29 = vpop.f32.mrb[8].mxu1 }
 0x25d   :  { %v993_v45 = vadd.f32 %v1805_v29, %v920_v36  ;;  %v987_v46 = vpop.f32.mrb[9].mxu1  ;;  %2074 = vmatprep.subr.bf16.mxu0 %v2073_v42  ;;  %v1348_v29 = vld [vmem:[%s2849_s4 + $0x108] sm:$0xff] }
 0x25e   :  { %v988_v49 = vadd.f32 %v987_v46, %v920_v36  ;;  %v1350_v46 = vld [vmem:[%s2849_s4 + $0x118] sm:$0xff] }
 0x25f   :  { %v1011_v50 = vand.u32 2147483647, %v993_v45  ;;  %v1007_v16 = vmax.f32 %v993_v45, 0.0  ;;  %v2145_v47 = vpack.c.bf16 %v1350_v46, %v1349_v44 }
 0x260   :  { %v1010_v51 = vand.u32 2147483647, %v988_v49  ;;  %2076 = vmatpush3.bf16.msra.mxu0 %v2073_v42  ;;  %v1808_v52 = vpop.f32.mrb[10].mxu1  ;;  %v1006_v19 = vmax.f32 %v988_v49, 0.0  ;;  %v1347_v42 = vld [vmem:[%s2849_s4 + $0x100] sm:$0xff] }
 0x261   :  { %v1015_v59 = vsub.f32 0.0, %v1011_v50  ;;  %v1003_v60 = vadd.f32 %v1808_v52, %v920_v36  ;;  %v997_v20 = vpop.f32.mrb[11].mxu1  ;;  %v2141_v45 = vpack.c.bf16 %v1348_v29, %v1347_v42  ;;  %v1351_v49 = vld [vmem:[%s2849_s4 + $0x120] sm:$0xff]  ;;  %v1352_v50 = vld [vmem:[%s2849_s4 + $0x128] sm:$0xff]  ;;  %v1353_v52 = vld [vmem:[%s2849_s4 + $0x130] sm:$0xff] }
 0x262   :  { %v1014_v62 = vsub.f32 0.0, %v1010_v51  ;;  %v998_v63 = vadd.f32 %v997_v20, %v920_v36  ;;  %v2149_v51 = vpack.c.bf16 %v1352_v50, %v1351_v49  ;;  %v1357_v20 = vld [vmem:[%s2849_s4 + $0x150] sm:$0xff] }
 0x263   :  { %v1020_v38 = vmul.f32 1.442695, %v1015_v59  ;;  %v1013_v0 = vand.u32 2147483647, %v1003_v60  ;;  %1766 = vmatmul.mubr.f32.vlgmr.msra.gmra.mrb[8].mxu0 %v344_v55  ;;  %v1009_v24 = vmax.f32 %v1003_v60, 0.0  ;;  %2142 = vmatprep.subr.bf16.mxu0 %v2141_v45  ;;  %v2153_v55 = vpack.c.bf16 %v1354_v53, %v1353_v52  ;;  %v1356_v59 = vld [vmem:[%s2849_s4 + $0x148] sm:$0xff] }
 0x264   :  { %v1018_v57 = vmul.f32 1.442695, %v1014_v62  ;;  %v1012_v1 = vand.u32 2147483647, %v998_v63  ;;  %1768 = vmatprep.mubr.f32.mxu0 %v345_v21  ;;  %v1008_v26 = vmax.f32 %v998_v63, 0.0  ;;  %2173 = vmatprep.subr.bf16.mxu1 %v2141_v45  ;;  %v2157_v60 = vpack.c.bf16 %v1356_v59, %v1355_v39  ;;  %v1359_v62 = vld [vmem:[%s2849_s4 + $0x160] sm:$0xff] }
 0x265   :  { %2281 = vpow2.f32 %v1020_v38  ;;  %v1017_v4 = vsub.f32 0.0, %v1013_v0  ;;  %2144 = vmatpush3.bf16.msra.mxu0 %v2141_v45  ;;  %v2161_v21 = vpack.c.bf16 %v1358_v54, %v1357_v20  ;;  %v1360_v63 = vld [vmem:[%s2849_s4 + $0x168] sm:$0xff]  ;;  %v1361_v0 = vld [vmem:[%s2849_s4 + $0x170] sm:$0xff] }
 0x266   :  { %2283 = vpow2.f32 %v1018_v57  ;;  %v1016_v5 = vsub.f32 0.0, %v1012_v1  ;;  %2146 = vmatprep.subr.bf16.mxu0 %v2145_v47  ;;  %v2165_v38 = vpack.c.bf16 %v1360_v63, %v1359_v62  ;;  %v1362_v57 = vld [vmem:[%s2849_s4 + $0x178] sm:$0xff] }
 0x267   :  { %v1024_v56 = vmul.f32 1.442695, %v1017_v4  ;;  %1769 = vmatmul.mubr.f32.gmra.mrb[10].mxu0 %v346_v9  ;;  %v2169_v1 = vpack.c.bf16 %v1362_v57, %v1361_v0  ;;  %v1066_v4 = vrot.slane %v2763_v31, %v2714_v58 }
 0x268   :  { %v1022_v61 = vmul.f32 1.442695, %v1016_v5 }
 0x269   :  { %2285 = vpow2.f32 %v1024_v56  ;;  %2148 = vmatpush3.bf16.msra.mxu0 %v2145_v47 }
 0x26a   :  { %2287 = vpow2.f32 %v1022_v61  ;;  %2150 = vmatprep.subr.bf16.mxu0 %v2149_v51 }
 0x26d   :  { %2152 = vmatpush3.bf16.msra.mxu0 %v2149_v51 }
 0x26e   :  { %2154 = vmatprep.subr.bf16.mxu0 %v2153_v55 }
 0x26f   :  { %v2282_v35 = vpop.eup %2281 }
 0x270   :  { %v2284_v8 = vpop.eup %2283  ;;  %v1027_v40 = vadd.f32 1.0, %v2282_v35 }
 0x271   :  { %v1026_v37 = vadd.f32 1.0, %v2284_v8  ;;  %2156 = vmatpush3.bf16.msra.mxu0 %v2153_v55 }
 0x272   :  { %2289 = vlog2.f32 %v1027_v40  ;;  %2158 = vmatprep.subr.bf16.mxu0 %v2157_v60 }
 0x273   :  { %v2286_v34 = vpop.eup %2285  ;;  %2291 = vlog2.f32 %v1026_v37 }
 0x274   :  { %v2288_v11 = vpop.eup %2287  ;;  %v1029_v43 = vadd.f32 1.0, %v2286_v34 }
 0x275   :  { %v1028_v41 = vadd.f32 1.0, %v2288_v11  ;;  %2160 = vmatpush3.bf16.msra.mxu0 %v2157_v60 }
 0x276   :  { %2293 = vlog2.f32 %v1029_v43  ;;  %2162 = vmatprep.subr.bf16.mxu0 %v2161_v21 }
 0x277   :  { %2295 = vlog2.f32 %v1028_v41 }
 0x279   :  { %2164 = vmatpush3.bf16.msra.mxu0 %v2161_v21 }
 0x27a   :  { %2166 = vmatprep.subr.bf16.mxu0 %v2165_v38 }
 0x27c   :  { %v2290_v12 = vpop.eup %2289 }
 0x27d   :  { %v2292_v15 = vpop.eup %2291  ;;  %v1033_v48 = vmul.f32 0.6931472, %v2290_v12  ;;  %2168 = vmatpush3.bf16.msra.mxu0 %v2165_v38 }
 0x27e   :  { %v1031_v10 = vmul.f32 0.6931472, %v2292_v15  ;;  %2170 = vmatprep.subr.bf16.mxu0 %v2169_v1 }
 0x27f   :  { %v1039_v13 = vadd.f32 %v1033_v48, %v1007_v16 }
 0x280   :  { %v2294_v22 = vpop.eup %2293  ;;  %v1038_v23 = vadd.f32 %v1031_v10, %v1006_v19 }
 0x281   :  { %v2296_v14 = vpop.eup %2295  ;;  %v1037_v25 = vmul.f32 0.6931472, %v2294_v22  ;;  %v1344_v28 = vadd.f32 -0.6931472, %v1039_v13  ;;  %2172 = vmatpush3.bf16.msra.mxu0 %v2169_v1 }
 0x282   :  { %v1343_v18 = vadd.f32 -0.6931472, %v1038_v23  ;;  %v1035_v27 = vmul.f32 0.6931472, %v2296_v14 }
 0x283   :  { %v1041_v30 = vadd.f32 %v1037_v25, %v1009_v24 }
 0x284   :  { %1841 = vmatprep.mubr.f32.mxu1 %v1343_v18  ;;  %v1040_v32 = vadd.f32 %v1035_v27, %v1008_v26 }
 0x285   :  { %1842 = vmatmul.mubr.f32.vlgmr.msra.gmra.mrb[12].mxu1 %v1344_v28  ;;  %v1346_v36 = vadd.f32 -0.6931472, %v1041_v30 }
 0x286   :  { %v1345_v33 = vadd.f32 -0.6931472, %v1040_v32  ;;  %2181 = vmatpush3.bf16.msra.mxu1 %v2141_v45 }
 0x287   :  { %2174 = vmatprep.subr.bf16.mxu1 %v2145_v47 }
 0x288   :  { %1844 = vmatprep.mubr.f32.mxu1 %v1345_v33 }
 0x289   :  { %1845 = vmatmul.mubr.f32.gmra.mrb[14].mxu1 %v1346_v36 }
 0x28a   :  { %2182 = vmatpush3.bf16.msra.mxu1 %v2145_v47 }
 0x28b   :  { %2175 = vmatprep.subr.bf16.mxu1 %v2149_v51 }
 0x28e   :  { %2183 = vmatpush3.bf16.msra.mxu1 %v2149_v51 }
 0x28f   :  { %2176 = vmatprep.subr.bf16.mxu1 %v2153_v55 }
 0x292   :  { %2184 = vmatpush3.bf16.msra.mxu1 %v2153_v55 }
 0x293   :  { %2177 = vmatprep.subr.bf16.mxu1 %v2157_v60 }
 0x296   :  { %2185 = vmatpush3.bf16.msra.mxu1 %v2157_v60 }
 0x297   :  { %2178 = vmatprep.subr.bf16.mxu1 %v2161_v21 }
 0x29a   :  { %2186 = vmatpush3.bf16.msra.mxu1 %v2161_v21 }
 0x29b   :  { %2179 = vmatprep.subr.bf16.mxu1 %v2165_v38 }
 0x29e   :  { %2187 = vmatpush3.bf16.msra.mxu1 %v2165_v38 }
 0x29f   :  { %2180 = vmatprep.subr.bf16.mxu1 %v2169_v1 }
 0x2a2   :  { %2188 = vmatpush3.bf16.msra.mxu1 %v2169_v1 }
 0x33a   :  { %v1770_v2 = vpop.f32.mrb[10].mxu0 }
 0x33b   :  { %v844_v9 = vpop.f32.mrb[11].mxu0 }
 0x358   :  { %v1843_v5 = vpop.f32.mrb[12].mxu1 }
 0x359   :  { %v1139_v56 = vadd.f32 %v1843_v5, %v1066_v4  ;;  %v1133_v61 = vpop.f32.mrb[13].mxu1 }
 0x35a   :  { %v1134_v35 = vadd.f32 %v1133_v61, %v1066_v4 }
 0x35b   :  { %v1153_v37 = vadd.f32 %v1139_v56, %v2585_v6 }
 0x35c   :  { %v1152_v8 = vadd.f32 %v1134_v35, %v2560_v3  ;;  %v1846_v40 = vpop.f32.mrb[14].mxu1 }
 0x35d   :  { %v1149_v34 = vadd.f32 %v1846_v40, %v1066_v4  ;;  %v1143_v11 = vpop.f32.mrb[15].mxu1 }
 0x35e   :  { %v1144_v43 = vadd.f32 %v1143_v11, %v1066_v4  ;;  %1879 = vmatprep.mubr.f32.mxu0 %v1152_v8 }
 0x35f   :  { %1880 = vmatmul.mubr.f32.vlgmr.msra.gmra.mrb[8].mxu0 %v1153_v37  ;;  %v1155_v12 = vadd.f32 %v1149_v34, %v2591_v17 }
 0x360   :  { %v1154_v41 = vadd.f32 %v1144_v43, %v2587_v7 }
 0x362   :  { %1882 = vmatprep.mubr.f32.mxu1 %v1154_v41 }
 0x363   :  { %1883 = vmatmul.mubr.f32.vlgmr.msra.gmra.mrb[16].mxu1 %v1155_v12 }
 0x432   :  { %v1881_v58 = vpop.f32.mrb[8].mxu0 }
 0x433   :  { %1264 = vst.msk [vmem:[%s2850_s5 + $0x8] sm:$0xff] %vm1262_vm0, %v1881_v58  ;;  %v1239_v3 = vpop.f32.mrb[9].mxu0 }
 0x434   :  { %1263 = vst.msk [vmem:[%s2850_s5] sm:$0xff] %vm1262_vm0, %v1239_v3 }
 0x436   :  { %v1884_v6 = vpop.f32.mrb[16].mxu1 }
 0x437   :  { %v2189_v31 = vadd.f32 %v1884_v6, %v1770_v2  ;;  %v1249_v15 = vpop.f32.mrb[17].mxu1 }
 0x438   :  { %v2190_v16 = vadd.f32 %v1249_v15, %v844_v9 }
 0x439   :  { %1266 = vst.msk [vmem:[%s2850_s5 + $0x18] sm:$0xff] %vm1262_vm0, %v2189_v31 }
 0x43a   :  { %1265 = vst.msk [vmem:[%s2850_s5 + $0x10] sm:$0xff] %vm1262_vm0, %v2190_v16 }
 0x43b   :  { %1271 = vsyncpa [#allocation3], 1 }
 0x43c   :  { %1272 = vsyncpa [#allocation5], 1 }

</bundles_post_ra>
